<compile_context>
chip_gen: v7x
topology: tpu7x:2x2x1
jax: 0.10.0
libtpu: 0.0.40
codegen_flags: <defaults>
</compile_context>

<pallas_src>
import math
import functools

import jax
import jax.numpy as jnp
from jax.experimental import pallas as pl
from jax.experimental.pallas import tpu as pltpu


def _self_attention_kernel(
    x_q_ref, x_kv_ref,
    w_q_ref, w_k_ref, w_v_ref,
    b_q_ref, b_k_ref, b_v_ref,
    w_o_ref, b_o_ref,
    o_ref,
    q_scr, acc_scr, m_scr, l_scr,
    *, n_heads, d_head):
    """One (batch, q-tile, kv-tile) grid step of fused self-attention."""
    ki = pl.program_id(2)
    n_kv = pl.num_programs(2)
    dtype = x_q_ref.dtype  # MXU operand dtype: keep the input dtype (no upcast)

    # --- kv step 0: q projection for this query tile + online-softmax reset ---
    @pl.when(ki == 0)
    def _init():
        xq = x_q_ref[0]                                            # (tq, D)
        q = jnp.dot(xq, w_q_ref[...], preferred_element_type=jnp.float32)
        q = q + b_q_ref[0]              # 1/sqrt(d_head) already folded in host-side
        q_scr[...] = q.astype(q_scr.dtype)
        m_scr[...] = jnp.full_like(m_scr, -jnp.inf)
        l_scr[...] = jnp.zeros_like(l_scr)
        acc_scr[...] = jnp.zeros_like(acc_scr)

    # --- k / v projections for the current key tile (two slim matmuls) --------
    xkv = x_kv_ref[0]                                              # (tk, D)
    k = (jnp.dot(xkv, w_k_ref[...], preferred_element_type=jnp.float32)
         + b_k_ref[0]).astype(dtype)                               # (tk, D)
    v = (jnp.dot(xkv, w_v_ref[...], preferred_element_type=jnp.float32)
         + b_v_ref[0]).astype(dtype)                               # (tk, D)

    # --- per-head 2-D attention with online softmax (static unroll over H) ----
    for h in range(n_heads):
        sl = slice(h * d_head, (h + 1) * d_head)
        q_h = q_scr[:, sl]                                         # (tq, dh)
        k_h = k[:, sl]                                             # (tk, dh)
        v_h = v[:, sl]                                             # (tk, dh)

        # scores = q_h @ k_h^T  (contraction over d_head), f32 accumulation.
        s = jax.lax.dot_general(
            q_h, k_h, (((1,), (1,)), ((), ())),
            preferred_element_type=jnp.float32)                    # (tq, tk)

        m_prev = m_scr[h]                                          # (tq, 1)
        l_prev = l_scr[h]                                          # (tq, 1)
        m_new = jnp.maximum(m_prev, jnp.max(s, axis=-1, keepdims=True))
        alpha = jnp.exp(m_prev - m_new)                            # (tq, 1)
        p = jnp.exp(s - m_new)                                     # (tq, tk)
        l_scr[h] = alpha * l_prev + jnp.sum(p, axis=-1, keepdims=True)
        m_scr[h] = m_new
        pv = jnp.dot(p.astype(v_h.dtype), v_h,
                     preferred_element_type=jnp.float32)           # (tq, dh)
        acc_scr[h] = alpha * acc_scr[h] + pv

    # --- last kv step: normalize, fused output projection, store --------------
    @pl.when(ki == n_kv - 1)
    def _finalize():
        outs = []
        for h in range(n_heads):
            inv_l = pl.reciprocal(l_scr[h], approx=True)           # EUP slot
            outs.append(acc_scr[h] * inv_l)                        # (tq, dh)
        attn = jnp.concatenate(outs, axis=-1).astype(dtype)        # (tq, D)
        y = jnp.dot(attn, w_o_ref[...], preferred_element_type=jnp.float32)
        y = y + b_o_ref[0]
        o_ref[0] = y.astype(o_ref.dtype)


def _pick_tile(n, pref):
    """Use `pref` if it evenly tiles the axis, otherwise the full axis."""
    return pref if (n % pref == 0 and pref % 8 == 0) else n


def self_attention_pallas(x, w_in, b_in, w_out, b_out, *, n_heads,
                          q_tile=128, kv_tile=128):
    """x: (B, S, D). w_in: (3D, D), b_in: (3D,), w_out: (D, D), b_out: (D,)."""
    B, S, D = x.shape
    assert D % n_heads == 0
    d_head = D // n_heads
    scale = 1.0 / math.sqrt(d_head)
    dt = x.dtype

    # Host-side prep: split in_proj into q/k/v column blocks, pre-transpose so
    # the kernel does plain x @ W_T (+ b), fold the softmax scale into q, and
    # keep the matmul operands in the input dtype.
    w_q_t = (w_in[0 * D:1 * D, :] * scale).T.astype(dt)   # (D, D)
    w_k_t = w_in[1 * D:2 * D, :].T.astype(dt)             # (D, D)
    w_v_t = w_in[2 * D:3 * D, :].T.astype(dt)             # (D, D)
    w_o_t = w_out.T.astype(dt)                            # (D, D)
    b_q = (b_in[0 * D:1 * D] * scale).reshape(1, D).astype(jnp.float32)
    b_k = b_in[1 * D:2 * D].reshape(1, D).astype(jnp.float32)
    b_v = b_in[2 * D:3 * D].reshape(1, D).astype(jnp.float32)
    b_o = b_out.reshape(1, D).astype(jnp.float32)

    tq = _pick_tile(S, q_tile)
    tk = _pick_tile(S, kv_tile)
    grid = (B, S // tq, S // tk)

    kernel = functools.partial(_self_attention_kernel,
                               n_heads=n_heads, d_head=d_head)

    itemsize = jnp.dtype(dt).itemsize
    cost = pl.CostEstimate(
        flops=int(B * (8 * S * D * D + 4 * S * S * D)),
        transcendentals=int(B * n_heads * S * S),
        bytes_accessed=int(3 * B * S * D * itemsize + 4 * D * D * itemsize),
    )

    const2 = lambda b, qi, ki: (0, 0)   # invariant weight / bias blocks

    return pl.pallas_call(
        kernel,
        out_shape=jax.ShapeDtypeStruct((B, S, D), dt),
        grid_spec=pltpu.PrefetchScalarGridSpec(
            num_scalar_prefetch=0,
            grid=grid,
            in_specs=[
                pl.BlockSpec((1, tq, D), lambda b, qi, ki: (b, qi, 0)),  # x (query rows)
                pl.BlockSpec((1, tk, D), lambda b, qi, ki: (b, ki, 0)),  # x (key/value rows)
                pl.BlockSpec((D, D), const2),     # W_q^T (scale folded)
                pl.BlockSpec((D, D), const2),     # W_k^T
                pl.BlockSpec((D, D), const2),     # W_v^T
                pl.BlockSpec((1, D), const2),     # b_q  (scale folded)
                pl.BlockSpec((1, D), const2),     # b_k
                pl.BlockSpec((1, D), const2),     # b_v
                pl.BlockSpec((D, D), const2),     # W_out^T
                pl.BlockSpec((1, D), const2),     # b_out
            ],
            out_specs=pl.BlockSpec((1, tq, D), lambda b, qi, ki: (b, qi, 0)),
            scratch_shapes=[
                pltpu.VMEM((tq, D), dt),                       # q tile (pre-scaled)
                pltpu.VMEM((n_heads, tq, d_head), jnp.float32),  # attention accumulator
                pltpu.VMEM((n_heads, tq, 1), jnp.float32),       # running max m
                pltpu.VMEM((n_heads, tq, 1), jnp.float32),       # running denom l
            ],
        ),
        compiler_params=pltpu.CompilerParams(
            dimension_semantics=("parallel", "parallel", "arbitrary"),
            vmem_limit_bytes=32 * 1024 * 1024,
        ),
        cost_estimate=cost,
    )(x, x, w_q_t, w_k_t, w_v_t, b_q, b_k, b_v, w_o_t, b_o)


def self_attention_ref(x, w_in, b_in, w_out, b_out, *, n_heads):
    """Pure-JAX reference mirroring the PyTorch forward (non-causal)."""
    B, S, D = x.shape
    d_head = D // n_heads
    qkv = x @ w_in.T + b_in
    q, k, v = jnp.split(qkv, 3, axis=-1)
    q = q.reshape(B, S, n_heads, d_head).transpose(0, 2, 1, 3)
    k = k.reshape(B, S, n_heads, d_head).transpose(0, 2, 1, 3)
    v = v.reshape(B, S, n_heads, d_head).transpose(0, 2, 1, 3)
    w = (q @ jnp.swapaxes(k, -1, -2)) / math.sqrt(d_head)
    w = jax.nn.softmax(w, axis=-1)
    out = (w @ v).transpose(0, 2, 1, 3).reshape(B, S, D)
    return out @ w_out.T + b_out


if __name__ == "__main__":
    # Small shapes consistent with the module: batch=2, seq=8, d_embed=32,
    # n_heads=4 (d_head=8).
    B, S, D, H = 2, 8, 32, 4

    key = jax.random.PRNGKey(0)
    kx, kw1, kb1, kw2, kb2 = jax.random.split(key, 5)

    x = jax.random.normal(kx, (B, S, D), dtype=jnp.float32)
    # Deterministic parameter init (shapes match nn.Linear in __init__):
    w_in = 0.02 * jax.random.normal(kw1, (3 * D, D), dtype=jnp.float32)
    b_in = 0.02 * jax.random.normal(kb1, (3 * D,), dtype=jnp.float32)
    w_out = 0.02 * jax.random.normal(kw2, (D, D), dtype=jnp.float32)
    b_out = 0.02 * jax.random.normal(kb2, (D,), dtype=jnp.float32)

    y = self_attention_pallas(x, w_in, b_in, w_out, b_out, n_heads=H)
    y = jax.block_until_ready(y)

    y_ref = self_attention_ref(x, w_in, b_in, w_out, b_out, n_heads=H)
    assert y.shape == (B, S, D)
    # Slightly relaxed tolerance: approx (EUP) reciprocal in the softmax
    # normalization and host-side scale folding reorder a few f32 ops.
    assert jnp.allclose(y, y_ref, atol=1e-3, rtol=1e-3), "mismatch vs reference"

    print("KERNEL_OK")
</pallas_src>

<mosaic_0001>
module attributes {stable_mosaic.version = 11 : i64} {
  func.func @_self_attention_kernel(%arg0: i32, %arg1: i32, %arg2: i32, %arg3: memref<1x8x32xf32, #tpu.memory_space<vmem>>, %arg4: memref<1x8x32xf32, #tpu.memory_space<vmem>>, %arg5: memref<32x32xf32, #tpu.memory_space<vmem>>, %arg6: memref<32x32xf32, #tpu.memory_space<vmem>>, %arg7: memref<32x32xf32, #tpu.memory_space<vmem>>, %arg8: memref<1x32xf32, #tpu.memory_space<vmem>>, %arg9: memref<1x32xf32, #tpu.memory_space<vmem>>, %arg10: memref<1x32xf32, #tpu.memory_space<vmem>>, %arg11: memref<32x32xf32, #tpu.memory_space<vmem>>, %arg12: memref<1x32xf32, #tpu.memory_space<vmem>>, %arg13: memref<1x8x32xf32, #tpu.memory_space<vmem>>, %arg14: memref<8x32xf32, #tpu.memory_space<vmem>>, %arg15: memref<4x8x8xf32, #tpu.memory_space<vmem>>, %arg16: memref<4x8x1xf32, #tpu.memory_space<vmem>>, %arg17: memref<4x8x1xf32, #tpu.memory_space<vmem>>) attributes {dimension_semantics = [#tpu.dimension_semantics<parallel>, #tpu.dimension_semantics<parallel>, #tpu.dimension_semantics<arbitrary>], iteration_bounds = array<i64: 2, 1, 1>, scalar_prefetch = 0 : i64, scratch_operands = 4 : i64, tpu.core_type = #tpu.core_type<tc>, window_params = [{transform_indices = @transform_0, window_bounds = array<i64: 1, 8, 32>}, {transform_indices = @transform_1, window_bounds = array<i64: 1, 8, 32>}, {pipeline_mode = #tpu.pipeline_mode<synchronous>, transform_indices = @transform_2, window_bounds = array<i64: 32, 32>}, {pipeline_mode = #tpu.pipeline_mode<synchronous>, transform_indices = @transform_3, window_bounds = array<i64: 32, 32>}, {pipeline_mode = #tpu.pipeline_mode<synchronous>, transform_indices = @transform_4, window_bounds = array<i64: 32, 32>}, {pipeline_mode = #tpu.pipeline_mode<synchronous>, transform_indices = @transform_5, window_bounds = array<i64: 1, 32>}, {pipeline_mode = #tpu.pipeline_mode<synchronous>, transform_indices = @transform_6, window_bounds = array<i64: 1, 32>}, {pipeline_mode = #tpu.pipeline_mode<synchronous>, transform_indices = @transform_7, window_bounds = array<i64: 1, 32>}, {pipeline_mode = #tpu.pipeline_mode<synchronous>, transform_indices = @transform_8, window_bounds = array<i64: 32, 32>}, {pipeline_mode = #tpu.pipeline_mode<synchronous>, transform_indices = @transform_9, window_bounds = array<i64: 1, 32>}, {transform_indices = @transform_10, window_bounds = array<i64: 1, 8, 32>}]} {
    %c0_i32 = arith.constant 0 : i32
    %0 = arith.cmpi eq, %arg2, %c0_i32 : i32
    %1 = arith.extui %0 : i1 to i32
    %c0_i32_0 = arith.constant 0 : i32
    %2 = arith.cmpi ne, %1, %c0_i32_0 : i32
    scf.if %2 {
      %c0_104 = arith.constant 0 : index
      %c0_105 = arith.constant 0 : index
      %c0_106 = arith.constant 0 : index
      %162 = vector.load %arg3[%c0_104, %c0_105, %c0_106] : memref<1x8x32xf32, #tpu.memory_space<vmem>>, vector<1x8x32xf32>
      %163 = vector.shape_cast %162 : vector<1x8x32xf32> to vector<8x32xf32>
      %c0_107 = arith.constant 0 : index
      %c0_108 = arith.constant 0 : index
      %164 = vector.load %arg5[%c0_107, %c0_108] : memref<32x32xf32, #tpu.memory_space<vmem>>, vector<32x32xf32>
      %cst_109 = arith.constant dense<0.000000e+00> : vector<8x32xf32>
      %165 = tpu.matmul %163, %164, %cst_109 {dimension_numbers = #tpu.dot_dimension_numbers<[1], [0], [0], [1], [0, 0, 1, 1], [], []>} : vector<8x32xf32>, vector<32x32xf32>, vector<8x32xf32> -> vector<8x32xf32>
      %c0_110 = arith.constant 0 : index
      %c0_111 = arith.constant 0 : index
      %166 = vector.load %arg8[%c0_110, %c0_111] : memref<1x32xf32, #tpu.memory_space<vmem>>, vector<1x32xf32>
      %167 = vector.shape_cast %166 : vector<1x32xf32> to vector<32xf32>
      %168 = vector.shape_cast %167 : vector<32xf32> to vector<1x32xf32>
      %169 = vector.broadcast %168 : vector<1x32xf32> to vector<8x32xf32>
      %170 = arith.addf %165, %169 : vector<8x32xf32>
      %c0_112 = arith.constant 0 : index
      %c0_113 = arith.constant 0 : index
      %171 = vector.load %arg14[%c0_112, %c0_113] : memref<8x32xf32, #tpu.memory_space<vmem>>, vector<8x32xf32>
      tpu.vector_store %arg14[%c0_112, %c0_113], %170 {strides = array<i32>} : memref<8x32xf32, #tpu.memory_space<vmem>>, vector<8x32xf32>,
      %cst_114 = arith.constant 0xFF800000 : f32
      %172 = vector.broadcast %cst_114 : f32 to vector<4x8x1xf32>
      %c0_115 = arith.constant 0 : index
      %c0_116 = arith.constant 0 : index
      %c0_117 = arith.constant 0 : index
      %173 = vector.load %arg16[%c0_115, %c0_116, %c0_117] : memref<4x8x1xf32, #tpu.memory_space<vmem>>, vector<4x8x1xf32>
      tpu.vector_store %arg16[%c0_115, %c0_116, %c0_117], %172 {strides = array<i32>} : memref<4x8x1xf32, #tpu.memory_space<vmem>>, vector<4x8x1xf32>,
      %cst_118 = arith.constant 0.000000e+00 : f32
      %174 = vector.broadcast %cst_118 : f32 to vector<4x8x1xf32>
      %c0_119 = arith.constant 0 : index
      %c0_120 = arith.constant 0 : index
      %c0_121 = arith.constant 0 : index
      %175 = vector.load %arg17[%c0_119, %c0_120, %c0_121] : memref<4x8x1xf32, #tpu.memory_space<vmem>>, vector<4x8x1xf32>
      tpu.vector_store %arg17[%c0_119, %c0_120, %c0_121], %174 {strides = array<i32>} : memref<4x8x1xf32, #tpu.memory_space<vmem>>, vector<4x8x1xf32>,
      %cst_122 = arith.constant 0.000000e+00 : f32
      %176 = vector.broadcast %cst_122 : f32 to vector<4x8x8xf32>
      %c0_123 = arith.constant 0 : index
      %c0_124 = arith.constant 0 : index
      %c0_125 = arith.constant 0 : index
      %177 = vector.load %arg15[%c0_123, %c0_124, %c0_125] : memref<4x8x8xf32, #tpu.memory_space<vmem>>, vector<4x8x8xf32>
      tpu.vector_store %arg15[%c0_123, %c0_124, %c0_125], %176 {strides = array<i32>} : memref<4x8x8xf32, #tpu.memory_space<vmem>>, vector<4x8x8xf32>,
    } else {
    }
    %c0 = arith.constant 0 : index
    %c0_1 = arith.constant 0 : index
    %c0_2 = arith.constant 0 : index
    %3 = vector.load %arg4[%c0, %c0_1, %c0_2] : memref<1x8x32xf32, #tpu.memory_space<vmem>>, vector<1x8x32xf32>
    %4 = vector.shape_cast %3 : vector<1x8x32xf32> to vector<8x32xf32>
    %c0_3 = arith.constant 0 : index
    %c0_4 = arith.constant 0 : index
    %5 = vector.load %arg6[%c0_3, %c0_4] : memref<32x32xf32, #tpu.memory_space<vmem>>, vector<32x32xf32>
    %cst = arith.constant dense<0.000000e+00> : vector<8x32xf32>
    %6 = tpu.matmul %4, %5, %cst {dimension_numbers = #tpu.dot_dimension_numbers<[1], [0], [0], [1], [0, 0, 1, 1], [], []>} : vector<8x32xf32>, vector<32x32xf32>, vector<8x32xf32> -> vector<8x32xf32>
    %c0_5 = arith.constant 0 : index
    %c0_6 = arith.constant 0 : index
    %7 = vector.load %arg9[%c0_5, %c0_6] : memref<1x32xf32, #tpu.memory_space<vmem>>, vector<1x32xf32>
    %8 = vector.shape_cast %7 : vector<1x32xf32> to vector<32xf32>
    %9 = vector.shape_cast %8 : vector<32xf32> to vector<1x32xf32>
    %10 = vector.broadcast %9 : vector<1x32xf32> to vector<8x32xf32>
    %11 = arith.addf %6, %10 : vector<8x32xf32>
    %c0_7 = arith.constant 0 : index
    %c0_8 = arith.constant 0 : index
    %12 = vector.load %arg7[%c0_7, %c0_8] : memref<32x32xf32, #tpu.memory_space<vmem>>, vector<32x32xf32>
    %cst_9 = arith.constant dense<0.000000e+00> : vector<8x32xf32>
    %13 = tpu.matmul %4, %12, %cst_9 {dimension_numbers = #tpu.dot_dimension_numbers<[1], [0], [0], [1], [0, 0, 1, 1], [], []>} : vector<8x32xf32>, vector<32x32xf32>, vector<8x32xf32> -> vector<8x32xf32>
    %c0_10 = arith.constant 0 : index
    %c0_11 = arith.constant 0 : index
    %14 = vector.load %arg10[%c0_10, %c0_11] : memref<1x32xf32, #tpu.memory_space<vmem>>, vector<1x32xf32>
    %15 = vector.shape_cast %14 : vector<1x32xf32> to vector<32xf32>
    %16 = vector.shape_cast %15 : vector<32xf32> to vector<1x32xf32>
    %17 = vector.broadcast %16 : vector<1x32xf32> to vector<8x32xf32>
    %18 = arith.addf %13, %17 : vector<8x32xf32>
    %c0_12 = arith.constant 0 : index
    %c0_13 = arith.constant 0 : index
    %19 = vector.load %arg14[%c0_12, %c0_13] : memref<8x32xf32, #tpu.memory_space<vmem>>, vector<8x8xf32>
    %20 = vector.extract_strided_slice %11 {offsets = [0, 0], sizes = [8, 8], strides = [1, 1]} : vector<8x32xf32> to vector<8x8xf32>
    %21 = vector.extract_strided_slice %18 {offsets = [0, 0], sizes = [8, 8], strides = [1, 1]} : vector<8x32xf32> to vector<8x8xf32>
    %cst_14 = arith.constant dense<0.000000e+00> : vector<8x8xf32>
    %22 = tpu.matmul %19, %20, %cst_14 {dimension_numbers = #tpu.dot_dimension_numbers<[1], [1], [0], [0], [0, 0, 1, 0], [], []>} : vector<8x8xf32>, vector<8x8xf32>, vector<8x8xf32> -> vector<8x8xf32>
    %c0_15 = arith.constant 0 : index
    %c0_16 = arith.constant 0 : index
    %c0_17 = arith.constant 0 : index
    %23 = vector.load %arg16[%c0_15, %c0_16, %c0_17] : memref<4x8x1xf32, #tpu.memory_space<vmem>>, vector<1x8x1xf32>
    %24 = vector.shape_cast %23 : vector<1x8x1xf32> to vector<8x1xf32>
    %c0_18 = arith.constant 0 : index
    %c0_19 = arith.constant 0 : index
    %c0_20 = arith.constant 0 : index
    %25 = vector.load %arg17[%c0_18, %c0_19, %c0_20] : memref<4x8x1xf32, #tpu.memory_space<vmem>>, vector<1x8x1xf32>
    %26 = vector.shape_cast %25 : vector<1x8x1xf32> to vector<8x1xf32>
    %cst_21 = arith.constant dense<0xFF800000> : vector<8xf32>
    %27 = vector.multi_reduction <maximumf>, %22, %cst_21 [1] : vector<8x8xf32> to vector<8xf32>
    %28 = vector.shape_cast %27 : vector<8xf32> to vector<8x1xf32>
    %29 = arith.maximumf %24, %28 : vector<8x1xf32>
    %30 = arith.subf %24, %29 : vector<8x1xf32>
    %31 = math.exp %30 : vector<8x1xf32>
    %32 = vector.broadcast %29 : vector<8x1xf32> to vector<8x8xf32>
    %33 = arith.subf %22, %32 : vector<8x8xf32>
    %34 = math.exp %33 : vector<8x8xf32>
    %35 = arith.mulf %31, %26 : vector<8x1xf32>
    %cst_22 = arith.constant dense<0.000000e+00> : vector<8xf32>
    %36 = vector.multi_reduction <add>, %34, %cst_22 [1] : vector<8x8xf32> to vector<8xf32>
    %37 = vector.shape_cast %36 : vector<8xf32> to vector<8x1xf32>
    %38 = arith.addf %35, %37 : vector<8x1xf32>
    %c0_23 = arith.constant 0 : index
    %c0_24 = arith.constant 0 : index
    %c0_25 = arith.constant 0 : index
    %39 = vector.load %arg17[%c0_23, %c0_24, %c0_25] : memref<4x8x1xf32, #tpu.memory_space<vmem>>, vector<1x8x1xf32>
    %40 = vector.shape_cast %39 : vector<1x8x1xf32> to vector<8x1xf32>
    %41 = vector.shape_cast %38 : vector<8x1xf32> to vector<1x8x1xf32>
    tpu.vector_store %arg17[%c0_23, %c0_24, %c0_25], %41 {strides = array<i32>} : memref<4x8x1xf32, #tpu.memory_space<vmem>>, vector<1x8x1xf32>,
    %c0_26 = arith.constant 0 : index
    %c0_27 = arith.constant 0 : index
    %c0_28 = arith.constant 0 : index
    %42 = vector.load %arg16[%c0_26, %c0_27, %c0_28] : memref<4x8x1xf32, #tpu.memory_space<vmem>>, vector<1x8x1xf32>
    %43 = vector.shape_cast %42 : vector<1x8x1xf32> to vector<8x1xf32>
    %44 = vector.shape_cast %29 : vector<8x1xf32> to vector<1x8x1xf32>
    tpu.vector_store %arg16[%c0_26, %c0_27, %c0_28], %44 {strides = array<i32>} : memref<4x8x1xf32, #tpu.memory_space<vmem>>, vector<1x8x1xf32>,
    %cst_29 = arith.constant dense<0.000000e+00> : vector<8x8xf32>
    %45 = tpu.matmul %34, %21, %cst_29 {dimension_numbers = #tpu.dot_dimension_numbers<[1], [0], [0], [1], [0, 0, 1, 1], [], []>} : vector<8x8xf32>, vector<8x8xf32>, vector<8x8xf32> -> vector<8x8xf32>
    %c0_30 = arith.constant 0 : index
    %c0_31 = arith.constant 0 : index
    %c0_32 = arith.constant 0 : index
    %46 = vector.load %arg15[%c0_30, %c0_31, %c0_32] : memref<4x8x8xf32, #tpu.memory_space<vmem>>, vector<1x8x8xf32>
    %47 = vector.shape_cast %46 : vector<1x8x8xf32> to vector<8x8xf32>
    %48 = vector.broadcast %31 : vector<8x1xf32> to vector<8x8xf32>
    %49 = arith.mulf %48, %47 : vector<8x8xf32>
    %50 = arith.addf %49, %45 : vector<8x8xf32>
    %c0_33 = arith.constant 0 : index
    %c0_34 = arith.constant 0 : index
    %c0_35 = arith.constant 0 : index
    %51 = vector.load %arg15[%c0_33, %c0_34, %c0_35] : memref<4x8x8xf32, #tpu.memory_space<vmem>>, vector<1x8x8xf32>
    %52 = vector.shape_cast %51 : vector<1x8x8xf32> to vector<8x8xf32>
    %53 = vector.shape_cast %50 : vector<8x8xf32> to vector<1x8x8xf32>
    tpu.vector_store %arg15[%c0_33, %c0_34, %c0_35], %53 {strides = array<i32>} : memref<4x8x8xf32, #tpu.memory_space<vmem>>, vector<1x8x8xf32>,
    %c0_36 = arith.constant 0 : index
    %c8 = arith.constant 8 : index
    %54 = vector.load %arg14[%c0_36, %c8] : memref<8x32xf32, #tpu.memory_space<vmem>>, vector<8x8xf32>
    %55 = vector.extract_strided_slice %11 {offsets = [0, 8], sizes = [8, 8], strides = [1, 1]} : vector<8x32xf32> to vector<8x8xf32>
    %56 = vector.extract_strided_slice %18 {offsets = [0, 8], sizes = [8, 8], strides = [1, 1]} : vector<8x32xf32> to vector<8x8xf32>
    %cst_37 = arith.constant dense<0.000000e+00> : vector<8x8xf32>
    %57 = tpu.matmul %54, %55, %cst_37 {dimension_numbers = #tpu.dot_dimension_numbers<[1], [1], [0], [0], [0, 0, 1, 0], [], []>} : vector<8x8xf32>, vector<8x8xf32>, vector<8x8xf32> -> vector<8x8xf32>
    %c1 = arith.constant 1 : index
    %c0_38 = arith.constant 0 : index
    %c0_39 = arith.constant 0 : index
    %58 = vector.load %arg16[%c1, %c0_38, %c0_39] : memref<4x8x1xf32, #tpu.memory_space<vmem>>, vector<1x8x1xf32>
    %59 = vector.shape_cast %58 : vector<1x8x1xf32> to vector<8x1xf32>
    %c1_40 = arith.constant 1 : index
    %c0_41 = arith.constant 0 : index
    %c0_42 = arith.constant 0 : index
    %60 = vector.load %arg17[%c1_40, %c0_41, %c0_42] : memref<4x8x1xf32, #tpu.memory_space<vmem>>, vector<1x8x1xf32>
    %61 = vector.shape_cast %60 : vector<1x8x1xf32> to vector<8x1xf32>
    %cst_43 = arith.constant dense<0xFF800000> : vector<8xf32>
    %62 = vector.multi_reduction <maximumf>, %57, %cst_43 [1] : vector<8x8xf32> to vector<8xf32>
    %63 = vector.shape_cast %62 : vector<8xf32> to vector<8x1xf32>
    %64 = arith.maximumf %59, %63 : vector<8x1xf32>
    %65 = arith.subf %59, %64 : vector<8x1xf32>
    %66 = math.exp %65 : vector<8x1xf32>
    %67 = vector.broadcast %64 : vector<8x1xf32> to vector<8x8xf32>
    %68 = arith.subf %57, %67 : vector<8x8xf32>
    %69 = math.exp %68 : vector<8x8xf32>
    %70 = arith.mulf %66, %61 : vector<8x1xf32>
    %cst_44 = arith.constant dense<0.000000e+00> : vector<8xf32>
    %71 = vector.multi_reduction <add>, %69, %cst_44 [1] : vector<8x8xf32> to vector<8xf32>
    %72 = vector.shape_cast %71 : vector<8xf32> to vector<8x1xf32>
    %73 = arith.addf %70, %72 : vector<8x1xf32>
    %c1_45 = arith.constant 1 : index
    %c0_46 = arith.constant 0 : index
    %c0_47 = arith.constant 0 : index
    %74 = vector.load %arg17[%c1_45, %c0_46, %c0_47] : memref<4x8x1xf32, #tpu.memory_space<vmem>>, vector<1x8x1xf32>
    %75 = vector.shape_cast %74 : vector<1x8x1xf32> to vector<8x1xf32>
    %76 = vector.shape_cast %73 : vector<8x1xf32> to vector<1x8x1xf32>
    tpu.vector_store %arg17[%c1_45, %c0_46, %c0_47], %76 {strides = array<i32>} : memref<4x8x1xf32, #tpu.memory_space<vmem>>, vector<1x8x1xf32>,
    %c1_48 = arith.constant 1 : index
    %c0_49 = arith.constant 0 : index
    %c0_50 = arith.constant 0 : index
    %77 = vector.load %arg16[%c1_48, %c0_49, %c0_50] : memref<4x8x1xf32, #tpu.memory_space<vmem>>, vector<1x8x1xf32>
    %78 = vector.shape_cast %77 : vector<1x8x1xf32> to vector<8x1xf32>
    %79 = vector.shape_cast %64 : vector<8x1xf32> to vector<1x8x1xf32>
    tpu.vector_store %arg16[%c1_48, %c0_49, %c0_50], %79 {strides = array<i32>} : memref<4x8x1xf32, #tpu.memory_space<vmem>>, vector<1x8x1xf32>,
    %cst_51 = arith.constant dense<0.000000e+00> : vector<8x8xf32>
    %80 = tpu.matmul %69, %56, %cst_51 {dimension_numbers = #tpu.dot_dimension_numbers<[1], [0], [0], [1], [0, 0, 1, 1], [], []>} : vector<8x8xf32>, vector<8x8xf32>, vector<8x8xf32> -> vector<8x8xf32>
    %c1_52 = arith.constant 1 : index
    %c0_53 = arith.constant 0 : index
    %c0_54 = arith.constant 0 : index
    %81 = vector.load %arg15[%c1_52, %c0_53, %c0_54] : memref<4x8x8xf32, #tpu.memory_space<vmem>>, vector<1x8x8xf32>
    %82 = vector.shape_cast %81 : vector<1x8x8xf32> to vector<8x8xf32>
    %83 = vector.broadcast %66 : vector<8x1xf32> to vector<8x8xf32>
    %84 = arith.mulf %83, %82 : vector<8x8xf32>
    %85 = arith.addf %84, %80 : vector<8x8xf32>
    %c1_55 = arith.constant 1 : index
    %c0_56 = arith.constant 0 : index
    %c0_57 = arith.constant 0 : index
    %86 = vector.load %arg15[%c1_55, %c0_56, %c0_57] : memref<4x8x8xf32, #tpu.memory_space<vmem>>, vector<1x8x8xf32>
    %87 = vector.shape_cast %86 : vector<1x8x8xf32> to vector<8x8xf32>
    %88 = vector.shape_cast %85 : vector<8x8xf32> to vector<1x8x8xf32>
    tpu.vector_store %arg15[%c1_55, %c0_56, %c0_57], %88 {strides = array<i32>} : memref<4x8x8xf32, #tpu.memory_space<vmem>>, vector<1x8x8xf32>,
    %c0_58 = arith.constant 0 : index
    %c16 = arith.constant 16 : index
    %89 = vector.load %arg14[%c0_58, %c16] : memref<8x32xf32, #tpu.memory_space<vmem>>, vector<8x8xf32>
    %90 = vector.extract_strided_slice %11 {offsets = [0, 16], sizes = [8, 8], strides = [1, 1]} : vector<8x32xf32> to vector<8x8xf32>
    %91 = vector.extract_strided_slice %18 {offsets = [0, 16], sizes = [8, 8], strides = [1, 1]} : vector<8x32xf32> to vector<8x8xf32>
    %cst_59 = arith.constant dense<0.000000e+00> : vector<8x8xf32>
    %92 = tpu.matmul %89, %90, %cst_59 {dimension_numbers = #tpu.dot_dimension_numbers<[1], [1], [0], [0], [0, 0, 1, 0], [], []>} : vector<8x8xf32>, vector<8x8xf32>, vector<8x8xf32> -> vector<8x8xf32>
    %c2 = arith.constant 2 : index
    %c0_60 = arith.constant 0 : index
    %c0_61 = arith.constant 0 : index
    %93 = vector.load %arg16[%c2, %c0_60, %c0_61] : memref<4x8x1xf32, #tpu.memory_space<vmem>>, vector<1x8x1xf32>
    %94 = vector.shape_cast %93 : vector<1x8x1xf32> to vector<8x1xf32>
    %c2_62 = arith.constant 2 : index
    %c0_63 = arith.constant 0 : index
    %c0_64 = arith.constant 0 : index
    %95 = vector.load %arg17[%c2_62, %c0_63, %c0_64] : memref<4x8x1xf32, #tpu.memory_space<vmem>>, vector<1x8x1xf32>
    %96 = vector.shape_cast %95 : vector<1x8x1xf32> to vector<8x1xf32>
    %cst_65 = arith.constant dense<0xFF800000> : vector<8xf32>
    %97 = vector.multi_reduction <maximumf>, %92, %cst_65 [1] : vector<8x8xf32> to vector<8xf32>
    %98 = vector.shape_cast %97 : vector<8xf32> to vector<8x1xf32>
    %99 = arith.maximumf %94, %98 : vector<8x1xf32>
    %100 = arith.subf %94, %99 : vector<8x1xf32>
    %101 = math.exp %100 : vector<8x1xf32>
    %102 = vector.broadcast %99 : vector<8x1xf32> to vector<8x8xf32>
    %103 = arith.subf %92, %102 : vector<8x8xf32>
    %104 = math.exp %103 : vector<8x8xf32>
    %105 = arith.mulf %101, %96 : vector<8x1xf32>
    %cst_66 = arith.constant dense<0.000000e+00> : vector<8xf32>
    %106 = vector.multi_reduction <add>, %104, %cst_66 [1] : vector<8x8xf32> to vector<8xf32>
    %107 = vector.shape_cast %106 : vector<8xf32> to vector<8x1xf32>
    %108 = arith.addf %105, %107 : vector<8x1xf32>
    %c2_67 = arith.constant 2 : index
    %c0_68 = arith.constant 0 : index
    %c0_69 = arith.constant 0 : index
    %109 = vector.load %arg17[%c2_67, %c0_68, %c0_69] : memref<4x8x1xf32, #tpu.memory_space<vmem>>, vector<1x8x1xf32>
    %110 = vector.shape_cast %109 : vector<1x8x1xf32> to vector<8x1xf32>
    %111 = vector.shape_cast %108 : vector<8x1xf32> to vector<1x8x1xf32>
    tpu.vector_store %arg17[%c2_67, %c0_68, %c0_69], %111 {strides = array<i32>} : memref<4x8x1xf32, #tpu.memory_space<vmem>>, vector<1x8x1xf32>,
    %c2_70 = arith.constant 2 : index
    %c0_71 = arith.constant 0 : index
    %c0_72 = arith.constant 0 : index
    %112 = vector.load %arg16[%c2_70, %c0_71, %c0_72] : memref<4x8x1xf32, #tpu.memory_space<vmem>>, vector<1x8x1xf32>
    %113 = vector.shape_cast %112 : vector<1x8x1xf32> to vector<8x1xf32>
    %114 = vector.shape_cast %99 : vector<8x1xf32> to vector<1x8x1xf32>
    tpu.vector_store %arg16[%c2_70, %c0_71, %c0_72], %114 {strides = array<i32>} : memref<4x8x1xf32, #tpu.memory_space<vmem>>, vector<1x8x1xf32>,
    %cst_73 = arith.constant dense<0.000000e+00> : vector<8x8xf32>
    %115 = tpu.matmul %104, %91, %cst_73 {dimension_numbers = #tpu.dot_dimension_numbers<[1], [0], [0], [1], [0, 0, 1, 1], [], []>} : vector<8x8xf32>, vector<8x8xf32>, vector<8x8xf32> -> vector<8x8xf32>
    %c2_74 = arith.constant 2 : index
    %c0_75 = arith.constant 0 : index
    %c0_76 = arith.constant 0 : index
    %116 = vector.load %arg15[%c2_74, %c0_75, %c0_76] : memref<4x8x8xf32, #tpu.memory_space<vmem>>, vector<1x8x8xf32>
    %117 = vector.shape_cast %116 : vector<1x8x8xf32> to vector<8x8xf32>
    %118 = vector.broadcast %101 : vector<8x1xf32> to vector<8x8xf32>
    %119 = arith.mulf %118, %117 : vector<8x8xf32>
    %120 = arith.addf %119, %115 : vector<8x8xf32>
    %c2_77 = arith.constant 2 : index
    %c0_78 = arith.constant 0 : index
    %c0_79 = arith.constant 0 : index
    %121 = vector.load %arg15[%c2_77, %c0_78, %c0_79] : memref<4x8x8xf32, #tpu.memory_space<vmem>>, vector<1x8x8xf32>
    %122 = vector.shape_cast %121 : vector<1x8x8xf32> to vector<8x8xf32>
    %123 = vector.shape_cast %120 : vector<8x8xf32> to vector<1x8x8xf32>
    tpu.vector_store %arg15[%c2_77, %c0_78, %c0_79], %123 {strides = array<i32>} : memref<4x8x8xf32, #tpu.memory_space<vmem>>, vector<1x8x8xf32>,
    %c0_80 = arith.constant 0 : index
    %c24 = arith.constant 24 : index
    %124 = vector.load %arg14[%c0_80, %c24] : memref<8x32xf32, #tpu.memory_space<vmem>>, vector<8x8xf32>
    %125 = vector.extract_strided_slice %11 {offsets = [0, 24], sizes = [8, 8], strides = [1, 1]} : vector<8x32xf32> to vector<8x8xf32>
    %126 = vector.extract_strided_slice %18 {offsets = [0, 24], sizes = [8, 8], strides = [1, 1]} : vector<8x32xf32> to vector<8x8xf32>
    %cst_81 = arith.constant dense<0.000000e+00> : vector<8x8xf32>
    %127 = tpu.matmul %124, %125, %cst_81 {dimension_numbers = #tpu.dot_dimension_numbers<[1], [1], [0], [0], [0, 0, 1, 0], [], []>} : vector<8x8xf32>, vector<8x8xf32>, vector<8x8xf32> -> vector<8x8xf32>
    %c3 = arith.constant 3 : index
    %c0_82 = arith.constant 0 : index
    %c0_83 = arith.constant 0 : index
    %128 = vector.load %arg16[%c3, %c0_82, %c0_83] : memref<4x8x1xf32, #tpu.memory_space<vmem>>, vector<1x8x1xf32>
    %129 = vector.shape_cast %128 : vector<1x8x1xf32> to vector<8x1xf32>
    %c3_84 = arith.constant 3 : index
    %c0_85 = arith.constant 0 : index
    %c0_86 = arith.constant 0 : index
    %130 = vector.load %arg17[%c3_84, %c0_85, %c0_86] : memref<4x8x1xf32, #tpu.memory_space<vmem>>, vector<1x8x1xf32>
    %131 = vector.shape_cast %130 : vector<1x8x1xf32> to vector<8x1xf32>
    %cst_87 = arith.constant dense<0xFF800000> : vector<8xf32>
    %132 = vector.multi_reduction <maximumf>, %127, %cst_87 [1] : vector<8x8xf32> to vector<8xf32>
    %133 = vector.shape_cast %132 : vector<8xf32> to vector<8x1xf32>
    %134 = arith.maximumf %129, %133 : vector<8x1xf32>
    %135 = arith.subf %129, %134 : vector<8x1xf32>
    %136 = math.exp %135 : vector<8x1xf32>
    %137 = vector.broadcast %134 : vector<8x1xf32> to vector<8x8xf32>
    %138 = arith.subf %127, %137 : vector<8x8xf32>
    %139 = math.exp %138 : vector<8x8xf32>
    %140 = arith.mulf %136, %131 : vector<8x1xf32>
    %cst_88 = arith.constant dense<0.000000e+00> : vector<8xf32>
    %141 = vector.multi_reduction <add>, %139, %cst_88 [1] : vector<8x8xf32> to vector<8xf32>
    %142 = vector.shape_cast %141 : vector<8xf32> to vector<8x1xf32>
    %143 = arith.addf %140, %142 : vector<8x1xf32>
    %c3_89 = arith.constant 3 : index
    %c0_90 = arith.constant 0 : index
    %c0_91 = arith.constant 0 : index
    %144 = vector.load %arg17[%c3_89, %c0_90, %c0_91] : memref<4x8x1xf32, #tpu.memory_space<vmem>>, vector<1x8x1xf32>
    %145 = vector.shape_cast %144 : vector<1x8x1xf32> to vector<8x1xf32>
    %146 = vector.shape_cast %143 : vector<8x1xf32> to vector<1x8x1xf32>
    tpu.vector_store %arg17[%c3_89, %c0_90, %c0_91], %146 {strides = array<i32>} : memref<4x8x1xf32, #tpu.memory_space<vmem>>, vector<1x8x1xf32>,
    %c3_92 = arith.constant 3 : index
    %c0_93 = arith.constant 0 : index
    %c0_94 = arith.constant 0 : index
    %147 = vector.load %arg16[%c3_92, %c0_93, %c0_94] : memref<4x8x1xf32, #tpu.memory_space<vmem>>, vector<1x8x1xf32>
    %148 = vector.shape_cast %147 : vector<1x8x1xf32> to vector<8x1xf32>
    %149 = vector.shape_cast %134 : vector<8x1xf32> to vector<1x8x1xf32>
    tpu.vector_store %arg16[%c3_92, %c0_93, %c0_94], %149 {strides = array<i32>} : memref<4x8x1xf32, #tpu.memory_space<vmem>>, vector<1x8x1xf32>,
    %cst_95 = arith.constant dense<0.000000e+00> : vector<8x8xf32>
    %150 = tpu.matmul %139, %126, %cst_95 {dimension_numbers = #tpu.dot_dimension_numbers<[1], [0], [0], [1], [0, 0, 1, 1], [], []>} : vector<8x8xf32>, vector<8x8xf32>, vector<8x8xf32> -> vector<8x8xf32>
    %c3_96 = arith.constant 3 : index
    %c0_97 = arith.constant 0 : index
    %c0_98 = arith.constant 0 : index
    %151 = vector.load %arg15[%c3_96, %c0_97, %c0_98] : memref<4x8x8xf32, #tpu.memory_space<vmem>>, vector<1x8x8xf32>
    %152 = vector.shape_cast %151 : vector<1x8x8xf32> to vector<8x8xf32>
    %153 = vector.broadcast %136 : vector<8x1xf32> to vector<8x8xf32>
    %154 = arith.mulf %153, %152 : vector<8x8xf32>
    %155 = arith.addf %154, %150 : vector<8x8xf32>
    %c3_99 = arith.constant 3 : index
    %c0_100 = arith.constant 0 : index
    %c0_101 = arith.constant 0 : index
    %156 = vector.load %arg15[%c3_99, %c0_100, %c0_101] : memref<4x8x8xf32, #tpu.memory_space<vmem>>, vector<1x8x8xf32>
    %157 = vector.shape_cast %156 : vector<1x8x8xf32> to vector<8x8xf32>
    %158 = vector.shape_cast %155 : vector<8x8xf32> to vector<1x8x8xf32>
    tpu.vector_store %arg15[%c3_99, %c0_100, %c0_101], %158 {strides = array<i32>} : memref<4x8x8xf32, #tpu.memory_space<vmem>>, vector<1x8x8xf32>,
    %c0_i32_102 = arith.constant 0 : i32
    %159 = arith.cmpi eq, %arg2, %c0_i32_102 : i32
    %160 = arith.extui %159 : i1 to i32
    %c0_i32_103 = arith.constant 0 : i32
    %161 = arith.cmpi ne, %160, %c0_i32_103 : i32
    scf.if %161 {
      %c0_104 = arith.constant 0 : index
      %c0_105 = arith.constant 0 : index
      %c0_106 = arith.constant 0 : index
      %162 = vector.load %arg17[%c0_104, %c0_105, %c0_106] : memref<4x8x1xf32, #tpu.memory_space<vmem>>, vector<1x8x1xf32>
      %163 = vector.shape_cast %162 : vector<1x8x1xf32> to vector<8x1xf32>
      %164 = tpu.reciprocal %163 {approx = true} : vector<8x1xf32> -> vector<8x1xf32>
      %c0_107 = arith.constant 0 : index
      %c0_108 = arith.constant 0 : index
      %c0_109 = arith.constant 0 : index
      %165 = vector.load %arg15[%c0_107, %c0_108, %c0_109] : memref<4x8x8xf32, #tpu.memory_space<vmem>>, vector<1x8x8xf32>
      %166 = vector.shape_cast %165 : vector<1x8x8xf32> to vector<8x8xf32>
      %167 = vector.broadcast %164 : vector<8x1xf32> to vector<8x8xf32>
      %168 = arith.mulf %166, %167 : vector<8x8xf32>
      %c1_110 = arith.constant 1 : index
      %c0_111 = arith.constant 0 : index
      %c0_112 = arith.constant 0 : index
      %169 = vector.load %arg17[%c1_110, %c0_111, %c0_112] : memref<4x8x1xf32, #tpu.memory_space<vmem>>, vector<1x8x1xf32>
      %170 = vector.shape_cast %169 : vector<1x8x1xf32> to vector<8x1xf32>
      %171 = tpu.reciprocal %170 {approx = true} : vector<8x1xf32> -> vector<8x1xf32>
      %c1_113 = arith.constant 1 : index
      %c0_114 = arith.constant 0 : index
      %c0_115 = arith.constant 0 : index
      %172 = vector.load %arg15[%c1_113, %c0_114, %c0_115] : memref<4x8x8xf32, #tpu.memory_space<vmem>>, vector<1x8x8xf32>
      %173 = vector.shape_cast %172 : vector<1x8x8xf32> to vector<8x8xf32>
      %174 = vector.broadcast %171 : vector<8x1xf32> to vector<8x8xf32>
      %175 = arith.mulf %173, %174 : vector<8x8xf32>
      %c2_116 = arith.constant 2 : index
      %c0_117 = arith.constant 0 : index
      %c0_118 = arith.constant 0 : index
      %176 = vector.load %arg17[%c2_116, %c0_117, %c0_118] : memref<4x8x1xf32, #tpu.memory_space<vmem>>, vector<1x8x1xf32>
      %177 = vector.shape_cast %176 : vector<1x8x1xf32> to vector<8x1xf32>
      %178 = tpu.reciprocal %177 {approx = true} : vector<8x1xf32> -> vector<8x1xf32>
      %c2_119 = arith.constant 2 : index
      %c0_120 = arith.constant 0 : index
      %c0_121 = arith.constant 0 : index
      %179 = vector.load %arg15[%c2_119, %c0_120, %c0_121] : memref<4x8x8xf32, #tpu.memory_space<vmem>>, vector<1x8x8xf32>
      %180 = vector.shape_cast %179 : vector<1x8x8xf32> to vector<8x8xf32>
      %181 = vector.broadcast %178 : vector<8x1xf32> to vector<8x8xf32>
      %182 = arith.mulf %180, %181 : vector<8x8xf32>
      %c3_122 = arith.constant 3 : index
      %c0_123 = arith.constant 0 : index
      %c0_124 = arith.constant 0 : index
      %183 = vector.load %arg17[%c3_122, %c0_123, %c0_124] : memref<4x8x1xf32, #tpu.memory_space<vmem>>, vector<1x8x1xf32>
      %184 = vector.shape_cast %183 : vector<1x8x1xf32> to vector<8x1xf32>
      %185 = tpu.reciprocal %184 {approx = true} : vector<8x1xf32> -> vector<8x1xf32>
      %c3_125 = arith.constant 3 : index
      %c0_126 = arith.constant 0 : index
      %c0_127 = arith.constant 0 : index
      %186 = vector.load %arg15[%c3_125, %c0_126, %c0_127] : memref<4x8x8xf32, #tpu.memory_space<vmem>>, vector<1x8x8xf32>
      %187 = vector.shape_cast %186 : vector<1x8x8xf32> to vector<8x8xf32>
      %188 = vector.broadcast %185 : vector<8x1xf32> to vector<8x8xf32>
      %189 = arith.mulf %187, %188 : vector<8x8xf32>
      %190 = tpu.concatenate %168, %175, %182, %189 in 1 : vector<8x8xf32>, vector<8x8xf32>, vector<8x8xf32>, vector<8x8xf32> -> vector<8x32xf32>
      %c0_128 = arith.constant 0 : index
      %c0_129 = arith.constant 0 : index
      %191 = vector.load %arg11[%c0_128, %c0_129] : memref<32x32xf32, #tpu.memory_space<vmem>>, vector<32x32xf32>
      %cst_130 = arith.constant dense<0.000000e+00> : vector<8x32xf32>
      %192 = tpu.matmul %190, %191, %cst_130 {dimension_numbers = #tpu.dot_dimension_numbers<[1], [0], [0], [1], [0, 0, 1, 1], [], []>} : vector<8x32xf32>, vector<32x32xf32>, vector<8x32xf32> -> vector<8x32xf32>
      %c0_131 = arith.constant 0 : index
      %c0_132 = arith.constant 0 : index
      %193 = vector.load %arg12[%c0_131, %c0_132] : memref<1x32xf32, #tpu.memory_space<vmem>>, vector<1x32xf32>
      %194 = vector.shape_cast %193 : vector<1x32xf32> to vector<32xf32>
      %195 = vector.shape_cast %194 : vector<32xf32> to vector<1x32xf32>
      %196 = vector.broadcast %195 : vector<1x32xf32> to vector<8x32xf32>
      %197 = arith.addf %192, %196 : vector<8x32xf32>
      %c0_133 = arith.constant 0 : index
      %c0_134 = arith.constant 0 : index
      %c0_135 = arith.constant 0 : index
      %198 = vector.load %arg13[%c0_133, %c0_134, %c0_135] : memref<1x8x32xf32, #tpu.memory_space<vmem>>, vector<1x8x32xf32>
      %199 = vector.shape_cast %198 : vector<1x8x32xf32> to vector<8x32xf32>
      %200 = vector.shape_cast %197 : vector<8x32xf32> to vector<1x8x32xf32>
      tpu.vector_store %arg13[%c0_133, %c0_134, %c0_135], %200 {strides = array<i32>} : memref<1x8x32xf32, #tpu.memory_space<vmem>>, vector<1x8x32xf32>,
    } else {
    }
    return
  }
  func.func @transform_0(%arg0: i32, %arg1: i32, %arg2: i32) -> (i32, i32, i32) {
    %c0_i32 = arith.constant 0 : i32
    %c0_i32_0 = arith.constant 0 : i32
    return %arg0, %arg1, %c0_i32 : i32, i32, i32
  }
  func.func @transform_1(%arg0: i32, %arg1: i32, %arg2: i32) -> (i32, i32, i32) {
    %c0_i32 = arith.constant 0 : i32
    %c0_i32_0 = arith.constant 0 : i32
    return %arg0, %arg2, %c0_i32 : i32, i32, i32
  }
  func.func @transform_2(%arg0: i32, %arg1: i32, %arg2: i32) -> (i32, i32) {
    %c0_i32 = arith.constant 0 : i32
    %c0_i32_0 = arith.constant 0 : i32
    %c0_i32_1 = arith.constant 0 : i32
    return %c0_i32, %c0_i32_0 : i32, i32
  }
  func.func @transform_3(%arg0: i32, %arg1: i32, %arg2: i32) -> (i32, i32) {
    %c0_i32 = arith.constant 0 : i32
    %c0_i32_0 = arith.constant 0 : i32
    %c0_i32_1 = arith.constant 0 : i32
    return %c0_i32, %c0_i32_0 : i32, i32
  }
  func.func @transform_4(%arg0: i32, %arg1: i32, %arg2: i32) -> (i32, i32) {
    %c0_i32 = arith.constant 0 : i32
    %c0_i32_0 = arith.constant 0 : i32
    %c0_i32_1 = arith.constant 0 : i32
    return %c0_i32, %c0_i32_0 : i32, i32
  }
  func.func @transform_5(%arg0: i32, %arg1: i32, %arg2: i32) -> (i32, i32) {
    %c0_i32 = arith.constant 0 : i32
    %c0_i32_0 = arith.constant 0 : i32
    %c0_i32_1 = arith.constant 0 : i32
    return %c0_i32, %c0_i32_0 : i32, i32
  }
  func.func @transform_6(%arg0: i32, %arg1: i32, %arg2: i32) -> (i32, i32) {
    %c0_i32 = arith.constant 0 : i32
    %c0_i32_0 = arith.constant 0 : i32
    %c0_i32_1 = arith.constant 0 : i32
    return %c0_i32, %c0_i32_0 : i32, i32
  }
  func.func @transform_7(%arg0: i32, %arg1: i32, %arg2: i32) -> (i32, i32) {
    %c0_i32 = arith.constant 0 : i32
    %c0_i32_0 = arith.constant 0 : i32
    %c0_i32_1 = arith.constant 0 : i32
    return %c0_i32, %c0_i32_0 : i32, i32
  }
  func.func @transform_8(%arg0: i32, %arg1: i32, %arg2: i32) -> (i32, i32) {
    %c0_i32 = arith.constant 0 : i32
    %c0_i32_0 = arith.constant 0 : i32
    %c0_i32_1 = arith.constant 0 : i32
    return %c0_i32, %c0_i32_0 : i32, i32
  }
  func.func @transform_9(%arg0: i32, %arg1: i32, %arg2: i32) -> (i32, i32) {
    %c0_i32 = arith.constant 0 : i32
    %c0_i32_0 = arith.constant 0 : i32
    %c0_i32_1 = arith.constant 0 : i32
    return %c0_i32, %c0_i32_0 : i32, i32
  }
  func.func @transform_10(%arg0: i32, %arg1: i32, %arg2: i32) -> (i32, i32, i32) {
    %c0_i32 = arith.constant 0 : i32
    %c0_i32_0 = arith.constant 0 : i32
    return %arg0, %arg1, %c0_i32 : i32, i32, i32
  }
}

</mosaic_0001>

<bundles_post_ra>
// kernel: tpu_custom_call.1
= control target key start
LH: loop header
LB: loop body
LE: loop exit
PB: predicated region body
PF: predicated region fallthrough
CT: control target
= control target key end

     0   :  { %s3013_s0 = inlined_call_operand.hbm [shape: f32[2,8,32], index: 0, kind: input, shape index: {}]   ;;  %s3014_s1 = inlined_call_operand.hbm [shape: f32[2,8,32], index: 1, kind: input, shape index: {}]   ;;  %s3015_s2 = inlined_call_operand.hbm [shape: f32[32,32], index: 2, kind: input, shape index: {}]   ;;  %s3016_s3 = inlined_call_operand.hbm [shape: f32[32,32], index: 3, kind: input, shape index: {}]   ;;  %s3017_s4 = inlined_call_operand.hbm [shape: f32[32,32], index: 4, kind: input, shape index: {}]   ;;  %s3018_s5 = inlined_call_operand.vmem [shape: f32[1,32], index: 5, kind: input, shape index: {}]   ;;  %s3019_s6 = inlined_call_operand.vmem [shape: f32[1,32], index: 6, kind: input, shape index: {}]   ;;  %s3020_s7 = inlined_call_operand.vmem [shape: f32[1,32], index: 7, kind: input, shape index: {}]   ;;  %s3021_s8 = inlined_call_operand.hbm [shape: f32[32,32], index: 8, kind: input, shape index: {}]   ;;  %s3022_s9 = inlined_call_operand.vmem [shape: f32[1,32], index: 9, kind: input, shape index: {}]   ;;  %s3023_s10 = inlined_call_operand.hbm [shape: f32[2,8,32], index: 10, kind: output, shape index: {}]  }
   0x1   :  { %3030 = sst [smem:[#allocation26_spill]] %s3015_s2 }
   0x2   :  { %3031 = sst [smem:[#allocation27_spill]] %s3016_s3 }
   0x3   :  { %3032 = sst [smem:[#allocation28_spill]] %s3017_s4 }
   0x4   :  { %3033 = sst [smem:[#allocation29_spill]] %s3020_s7 }
   0x5   :  { %3034 = sst [smem:[#allocation30_spill]] %s3021_s8 }
   0x6   :  { %3035 = sst [smem:[#allocation31_spill]] %s3022_s9 }
   0x7   :  { %3036 = sst [smem:[#allocation32_spill]] %s3023_s10 }
   0x8   :  { %15 = vsyncpa [#allocation7], 0 }
   0x9   :  { %17 = vsyncpa [#allocation7 + $0x1], 0 }
   0xa   :  { %18 = vsyncpa [#allocation10], 0 }
   0xb   :  { %20 = vsyncpa [#allocation10 + $0x1], 0 }
   0xc   :  { %21 = vsyncpa [#allocation13], 0 }
   0xd   :  { %22 = vsyncpa [#allocation16], 0 }
   0xe   :  { %23 = vsyncpa [#allocation8], 0 }
   0xf   :  { %25 = vsyncpa [#allocation8 + $0x1], 0  ;;  %s2514_s13 = smov 0   ;;  %s2516_s14 = smov 0  }
  0x10   :  { %s2518_s15 = smov 0   ;;  %s2520_s16 = smov 0  }
  0x11   :  { %s2522_s17 = smov 0   ;;  %s2524_s18 = smov 0  }
  0x12 LB: > { %3037 = sst [smem:[#allocation24_spill]] %s2429_s16  ;;  %s2545_s19 = sadd.s32 4294967295, %s2437_s18   ;;  %s2437_s18 = sphi %s2524_s18, %s31_s18   ;;  %s2433_s17 = sphi %s2522_s17, %s3072_s17   ;;  %s2429_s16 = sphi %s2520_s16, %s3071_s16   ;;  %s2425_s15 = sphi %s2518_s15, %s3070_s15   ;;  %s2421_s14 = sphi %s2516_s14, %s3069_s14   ;;  %s2417_s13 = sphi %s2514_s13, %s3068_s13  }
  0x13   : > { %p1834_p0 = scmp.ge.s32.totalorder %s2437_s18, 1  ;;  %p3025_p1 = scmp.eq.s32.totalorder %s2545_s19, 0 }
  0x14   : > { %p307_p2 = scmp.lt.s32.totalorder %s2437_s18, 3  ;;  %s2439_s21 = smov [#allocation11]  }
  0x15   : > { %s319_s22 = sshll.u32 %s2439_s21, 4  ;;  %s2440_s24 = smov [#allocation12]   ;;  %s2554_s22 = int_to_ptr.vmem [resolvable:$true] %s319_s22 }
  0x16   : > { %p2550_p3 = pnand %p1834_p0, %p307_p2  ;;  %s332_s25 = sshll.u32 %s2440_s24, 4  ;;  %s2565_s25 = int_to_ptr.vmem [resolvable:$true] %s332_s25 }
  0x17   : > { %s2441_s26 = smov [#allocation14]   ;;  %s3040_s2 = sld [smem:[#allocation26_spill]] }
  0x18   : > { %s3038_s20 = scalar_select %p2550_p3, 1, 0 }
  0x19   : > { %p2042_p4 = pneg %p2550_p3  ;;  %s2567_s27 = sshll.u32 %s2441_s26, 4  ;;  %s346_s27 = int_to_ptr.vmem [resolvable:$true] %s2567_s27 }
  0x1b   : > { %p2561_p6 = pnand %p2042_p4, %p3025_p1 }
  0x1d   : > { %s2167_s30 = scalar_lea.hbm %s3040_s2, 512  ;;  %p2577_p8 = pneg %p2561_p6 }
  0x1e   : > { %p2168_p7 = scmp.ne.s32.totalorder %s3040_s2, %s2167_s30  ;;  %p2174_p11 = scmp.lt.u32.totalorder %s2167_s30, %s3040_s2 }
  0x20   : > { %p2170_p9 = pnand %p2577_p8, %p2168_p7 }
  0x22   : > { %p2171_p10 = pneg %p2170_p9 }
  0x24   : > { %p2176_p12 = pnand %p2174_p11, %p2171_p10 }
  0x26   : > { %2179 = shalt.err (!%p2176_p12)
}
  0x27   : > { %s2180_s28 = scalar_lea.vmem %s2554_s22, 512  ;;  %p2188_p4 = scmp.lt.s32.totalorder %s2554_s22, %s2554_s22 }
  0x28   : > { %p2181_p13 = scmp.ne.s32.totalorder %s2554_s22, %s2180_s28  ;;  %p2189_p5 = scmp.lt.s32.totalorder %s2180_s28, %s2180_s28 }
  0x2a   : > { %p2183_p0 = pnand %p2181_p13, %p2577_p8  ;;  %p2190_p7 = por %p2189_p5, %p2188_p4 }
  0x2c   : > { %p2184_p2 = pneg %p2183_p0 }
  0x2e   : > { %p2191_p9 = pnand %p2190_p7, %p2184_p2 }
  0x30   : > { %2194 = shalt.err (!%p2191_p9)
}
  0x31   : > { %s2442_s29 = smov 128   ;;  %s2443_s30 = smov 8  }
  0x32   : > { %2045 = dma.hbm_to_vmem [thread:$0]  (!%p2561_p6), %s3040_s2, 512, %s2554_s22, [#allocation10], %s2442_s29, %s2442_s29, %s2443_s30  }
  0x33   : > { %s3042_s3 = sld [smem:[#allocation27_spill]] }
  0x39   : > { %s2195_s28 = scalar_lea.hbm %s3042_s3, 512 }
  0x3a   : > { %p2196_p5 = scmp.ne.s32.totalorder %s3042_s3, %s2195_s28  ;;  %p2202_p12 = scmp.lt.u32.totalorder %s2195_s28, %s3042_s3 }
  0x3c   : > { %p2198_p10 = pnand %p2196_p5, %p2577_p8 }
  0x3e   : > { %p2199_p11 = pneg %p2198_p10 }
  0x40   : > { %p2204_p13 = pnand %p2202_p12, %p2199_p11 }
  0x42   : > { %2207 = shalt.err (!%p2204_p13)
}
  0x43   : > { %s2208_s22 = scalar_lea.vmem %s2565_s25, 512  ;;  %p2216_p7 = scmp.lt.s32.totalorder %s2565_s25, %s2565_s25 }
  0x44   : > { %p2209_p0 = scmp.ne.s32.totalorder %s2565_s25, %s2208_s22  ;;  %p2217_p9 = scmp.lt.s32.totalorder %s2208_s22, %s2208_s22 }
  0x46   : > { %p2211_p2 = pnand %p2209_p0, %p2577_p8  ;;  %p2218_p5 = por %p2217_p9, %p2216_p7 }
  0x48   : > { %p2212_p4 = pneg %p2211_p2 }
  0x4a   : > { %p2219_p10 = pnand %p2218_p5, %p2212_p4 }
  0x4c   : > { %2222 = shalt.err (!%p2219_p10)
}
  0x4d   : > { %2048 = dma.hbm_to_vmem [thread:$0]  (!%p2561_p6), %s3042_s3, 512, %s2565_s25, [#allocation13], %s2442_s29, %s2442_s29, %s2443_s30  }
  0x4e   : > { %s3043_s4 = sld [smem:[#allocation28_spill]] }
  0x54   : > { %s2223_s11 = scalar_lea.hbm %s3043_s4, 512 }
  0x55   : > { %p2224_p11 = scmp.ne.s32.totalorder %s3043_s4, %s2223_s11  ;;  %p2230_p0 = scmp.lt.u32.totalorder %s2223_s11, %s3043_s4 }
  0x57   : > { %p2226_p12 = pnand %p2224_p11, %p2577_p8 }
  0x59   : > { %p2227_p13 = pneg %p2226_p12 }
  0x5b   : > { %p2232_p2 = pnand %p2230_p0, %p2227_p13 }
  0x5d   : > { %2235 = shalt.err (!%p2232_p2)
}
  0x5e   : > { %s2236_s22 = scalar_lea.vmem %s346_s27, 512  ;;  %p2244_p5 = scmp.lt.s32.totalorder %s346_s27, %s346_s27 }
  0x5f   : > { %p2237_p4 = scmp.ne.s32.totalorder %s346_s27, %s2236_s22  ;;  %p2245_p10 = scmp.lt.s32.totalorder %s2236_s22, %s2236_s22 }
  0x61   : > { %p2239_p7 = pnand %p2237_p4, %p2577_p8  ;;  %p2246_p1 = por %p2245_p10, %p2244_p5 }
  0x63   : > { %p2240_p9 = pneg %p2239_p7 }
  0x65   : > { %p2247_p3 = pnand %p2246_p1, %p2240_p9 }
  0x67   : > { %2250 = shalt.err (!%p2247_p3)
}
  0x68   : > { %2051 = dma.hbm_to_vmem [thread:$0]  (!%p2561_p6), %s3043_s4, 512, %s346_s27, [#allocation13], %s2442_s29, %s2442_s29, %s2443_s30  }
  0x69   : > { %s2444_s9 = smov [#allocation15]   ;;  %s3044_s8 = sld [smem:[#allocation30_spill]] }
  0x6a   : > { %s367_s10 = sshll.u32 %s2444_s9, 4  ;;  %s368_s10 = int_to_ptr.vmem [resolvable:$true] %s367_s10 }
  0x6f   : > { %s2251_s12 = scalar_lea.hbm %s3044_s8, 512 }
  0x70   : > { %p2252_p1 = scmp.ne.s32.totalorder %s3044_s8, %s2251_s12  ;;  %p2258_p12 = scmp.lt.u32.totalorder %s2251_s12, %s3044_s8 }
  0x72   : > { %p2254_p3 = pnand %p2252_p1, %p2577_p8 }
  0x74   : > { %p2255_p11 = pneg %p2254_p3 }
  0x76   : > { %p2260_p13 = pnand %p2258_p12, %p2255_p11 }
  0x78   : > { %2263 = shalt.err (!%p2260_p13)
}
  0x79   : > { %s2264_s27 = scalar_lea.vmem %s368_s10, 512  ;;  %p2272_p7 = scmp.lt.s32.totalorder %s368_s10, %s368_s10 }
  0x7a   : > { %p2265_p0 = scmp.ne.s32.totalorder %s368_s10, %s2264_s27  ;;  %p2273_p9 = scmp.lt.s32.totalorder %s2264_s27, %s2264_s27 }
  0x7c   : > { %p2267_p2 = pnand %p2265_p0, %p2577_p8  ;;  %p2274_p5 = por %p2273_p9, %p2272_p7 }
  0x7e   : > { %p2268_p4 = pneg %p2267_p2 }
  0x80   : > { %p2275_p10 = pnand %p2274_p5, %p2268_p4 }
  0x82   : > { %2278 = shalt.err (!%p2275_p10)
}
  0x83   : > { %2054 = dma.hbm_to_vmem [thread:$0]  (!%p2561_p6), %s3044_s8, 512, %s368_s10, [#allocation16], %s2442_s29, %s2442_s29, %s2443_s30  }
  0x84   : > { %s1833_s23 = sadd.s32 4294967294, %s2437_s18   ;;  %s50_s21 = sadd.s32 1, %s2433_s17 }
  0x85   : > { %p52_p8 = scmp.ge.s32.totalorder %s50_s21, 2  ;;  %s59_s9 = sadd.s32 1, %s2425_s15 }
  0x86   : > { %p66_p1 = scmp.ne.s32.totalorder %s2425_s15, %s2421_s14  ;;  %p67_p3 = scmp.eq.s32.totalorder %s2437_s18, 0 }
  0x87   : > { %s3074_s21 = smov (%p52_p8, %s50_s21), 0  ;;  %p72_p12 = scmp.ne.s32.totalorder %s2421_s14, %s2417_s13 }
  0x88   : > { %3045 = sst [smem:[#allocation25_spill]] %s3074_s21  ;;  %p2678_p11 = por %p67_p3, %p66_p1 }
  0x89   : > { %s54_s29 = ssub.s32 %s2433_s17, %s3074_s21  ;;  %p294_p6 = scmp.eq.s32.totalorder %s2545_s19, 1 }
  0x8a   : > { %p57_p13 = scmp.eq.s32.totalorder %s54_s29, 0  ;;  %p3047_p0 = scmp.eq.s32.totalorder %s2545_s19, 0 }
  0x8b   : > { %p2693_p4 = por %p294_p6, %p66_p1  ;;  %p300_p7 = scmp.eq.s32.totalorder %s1833_s23, 1 }
  0x8c   : > { %p2689_p2 = por %p3047_p0, %p72_p12  ;;  %p2070_p5 = scmp.lt.s32.totalorder %s2437_s18, 2 }
  0x8d   : > { %s3049_s10 = scalar_select %p2693_p4, 1, 0 }
  0x8e   : > { %s3048_s30 = scalar_select %p2689_p2, 1, 0 }
  0x8f   : > { %s2698_s11 = scalar_select %p57_p13, %s2425_s15, %s59_s9  }
  0x90   : > { %p2700_p9 = por %p300_p7, %p72_p12  ;;  %s384_s24 = sand.u32 1, %s2425_s15  }
  0x91   : > { %s1841_s26 = sshll.u32 %s2433_s17, 7  ;;  %s2707_s28 = sshll.u32 %s384_s24, 3 }
  0x92   : > { %s3050_s12 = scalar_select %p2700_p9, 1, 0 }
  0x93   : > { %s2712_s25 = scalar_lea.hbm %s3013_s0, %s1841_s26  ;;  %s388_s7 = scalar_lea.vmem [#allocation6], %s2707_s28 }
  0x94   : > { %s396_s23 = sshll.u32 %s388_s7, 4  ;;  %p2717_p10 = pnand %p2070_p5, %p2678_p11  ;;  %s2721_s23 = int_to_ptr.vmem [resolvable:$true] %s396_s23 }
  0x95   : > { %s2726_s27 = scalar_lea.hbm %s3014_s1, %s1841_s26  ;;  %s385_s2 = scalar_lea.sflag [#allocation7], %s384_s24 }
  0x96   : > { %s2279_s3 = scalar_lea.hbm %s2712_s25, 128  ;;  %p2281_p1 = pneg %p2717_p10 }
  0x97   : > { %p2280_p8 = scmp.ne.s32.totalorder %s2712_s25, %s2279_s3  ;;  %s2284_s4 = scalar_lea.hbm %s3013_s0, 256 }
  0x98   : > { %p2285_p12 = scmp.lt.u32.totalorder %s2712_s25, %s3013_s0  ;;  %p2286_p6 = scmp.lt.u32.totalorder %s2284_s4, %s2279_s3 }
  0x99   : > { %p2282_p3 = pnand %p2281_p1, %p2280_p8  ;;  %p2288_p0 = scmp.lt.u32.totalorder %s2279_s3, %s2712_s25 }
  0x9a   : > { %p2287_p13 = por %p2286_p6, %p2285_p12 }
  0x9b   : > { %p2283_p11 = pneg %p2282_p3 }
  0x9c   : > { %p2289_p7 = por %p2288_p0, %p2287_p13 }
  0x9e   : > { %p2290_p5 = pnand %p2289_p7, %p2283_p11 }
  0xa0   : > { %2293 = shalt.err (!%p2290_p5)
}
  0xa1   : > { %s2294_s24 = scalar_lea.vmem %s2721_s23, 128  ;;  %s2445_s26 = smov [#allocation6]  }
  0xa2   : > { %p2295_p8 = scmp.ne.s32.totalorder %s2721_s23, %s2294_s24  ;;  %s2299_s29 = sshll.u32 %s2445_s26, 4  ;;  %s2300_s29 = int_to_ptr.vmem [resolvable:$false] %s2299_s29 }
  0xa3   : > { %s2301_s8 = scalar_lea.vmem %s2300_s29, 256  ;;  %p2302_p4 = scmp.lt.s32.totalorder %s2721_s23, %s2300_s29 }
  0xa4   : > { %p2297_p3 = pnand %p2295_p8, %p2281_p1  ;;  %p2303_p12 = scmp.lt.s32.totalorder %s2301_s8, %s2294_s24 }
  0xa6   : > { %p2298_p9 = pneg %p2297_p3  ;;  %p2304_p6 = por %p2303_p12, %p2302_p4 }
  0xa8   : > { %p2305_p13 = pnand %p2304_p6, %p2298_p9 }
  0xaa   : > { %2308 = shalt.err (!%p2305_p13)
}
  0xab   : > { %2058 = dma.hbm_to_vmem [thread:$0]  (!%p2717_p10), %s2712_s25, 128, %s2721_s23, %s385_s2  }
  0xac   : > { %s403_s3 = sand.u32 1, %s2437_s18   ;;  %s407_s4 = scalar_lea.vmem [#allocation9], %s2707_s28 }
  0xad   : > { %s415_s21 = sshll.u32 %s407_s4, 4  ;;  %s404_s22 = scalar_lea.sflag [#allocation10], %s403_s3  ;;  %s416_s21 = int_to_ptr.vmem [resolvable:$true] %s415_s21 }
  0xae   : > { %s2309_s16 = scalar_lea.hbm %s2726_s27, 128  ;;  %s2314_s26 = scalar_lea.hbm %s3014_s1, 256 }
  0xaf   : > { %p2310_p4 = scmp.ne.s32.totalorder %s2726_s27, %s2309_s16  ;;  %p2315_p0 = scmp.lt.u32.totalorder %s2726_s27, %s3014_s1 }
  0xb0   : > { %p2316_p7 = scmp.lt.u32.totalorder %s2314_s26, %s2309_s16  ;;  %p2318_p8 = scmp.lt.u32.totalorder %s2309_s16, %s2726_s27 }
  0xb1   : > { %p2312_p9 = pnand %p2310_p4, %p2281_p1 }
  0xb2   : > { %p2317_p5 = por %p2316_p7, %p2315_p0 }
  0xb3   : > { %p2313_p11 = pneg %p2312_p9 }
  0xb4   : > { %p2319_p3 = por %p2318_p8, %p2317_p5 }
  0xb6   : > { %p2320_p12 = pnand %p2319_p3, %p2313_p11 }
  0xb8   : > { %2323 = shalt.err (!%p2320_p12)
}
  0xb9   : > { %s2324_s2 = scalar_lea.vmem %s416_s21, 128  ;;  %s2446_s28 = smov [#allocation9]  }
  0xba   : > { %p2325_p6 = scmp.ne.s32.totalorder %s416_s21, %s2324_s2  ;;  %s2329_s25 = sshll.u32 %s2446_s28, 4  ;;  %s2330_s25 = int_to_ptr.vmem [resolvable:$false] %s2329_s25 }
  0xbb   : > { %s2331_s23 = scalar_lea.vmem %s2330_s25, 256  ;;  %p2332_p9 = scmp.lt.s32.totalorder %s416_s21, %s2330_s25 }
  0xbc   : > { %p2327_p13 = pnand %p2325_p6, %p2281_p1  ;;  %p2333_p2 = scmp.lt.s32.totalorder %s2331_s23, %s2324_s2 }
  0xbe   : > { %p2328_p4 = pneg %p2327_p13  ;;  %p2334_p0 = por %p2333_p2, %p2332_p9 }
  0xc0   : > { %p2335_p7 = pnand %p2334_p0, %p2328_p4 }
  0xc2   : > { %2338 = shalt.err (!%p2335_p7)
}
  0xc3   : > { %2061 = dma.hbm_to_vmem [thread:$0]  (!%p2717_p10), %s2726_s27, 128, %s416_s21, %s404_s22  }
  0xc4   : > { %p3052_p11 = scmp.ne.s32.totalorder %s3038_s20, 0 }
  0xc5   : > { %s2777_s3 = sand.u32 (!%p3052_p11), 1, %s2421_s14   ;;  %p3053_p2 = scmp.ne.s32.totalorder (!%p3052_p11), %s3048_s30, 0 }
  0xc6   : > { %424 = sbr.rel (%p3052_p11) target bundleno = 2099 (0x833), region = 60  ;;  %s2780_s4 = sshll.u32 (!%p3052_p11), %s2777_s3, 3 }
  0xc7   : > { %s427_s16 = scalar_lea.sflag (!%p3052_p11), [#allocation7], %s2777_s3  ;;  %s430_s7 = scalar_lea.vmem (!%p3052_p11), [#allocation6], %s2780_s4 }
  0xcd   : > { %2392 = dma.done.wait (%p3053_p2), %s427_s16, 128  }
  0xce   : > { %2394 = vsyncadd (%p3053_p2), %s427_s16, 4294967168  ;;  %s435_s20 = sand.u32 1, %s2545_s19   ;;  %s439_s27 = scalar_lea.vmem [#allocation9], %s2780_s4 }
  0xcf   : > { %s436_s9 = scalar_lea.sflag [#allocation10], %s435_s20 }
  0xd0   : > { %2396 = dma.done.wait (%p3053_p2), %s436_s9, 128  }
  0xd1   : > { %2398 = vsyncadd (%p3053_p2), %s436_s9, 4294967168  ;;  %p3054_p10 = scmp.eq.s32.totalorder %s2545_s19, 0 }
  0xd3   : > { %2400 = dma.done.wait (%p3054_p10), [#allocation10], 512   ;;  %p3055_p1 = pmov %p3054_p10 }
  0xd5   : > { %2402 = vsyncadd (%p3055_p1), [#allocation10], 4294966784  ;;  %p3056_p5 = pmov %p3055_p1 }
  0xd6   : > { %p3057_p8 = pmov %p3055_p1 }
  0xd7   : > { %2404 = dma.done.wait (%p3056_p5), [#allocation13], 1024  }
  0xd8   : > { %2406 = vsyncadd (%p3057_p8), [#allocation13], 4294966272  ;;  %p3058_p3 = pmov %p3055_p1 }
  0xd9   : > { %p3059_p12 = pmov %p3055_p1 }
  0xda   : > { %2408 = dma.done.wait (%p3058_p3), [#allocation16], 512  }
  0xdb   : > { %2410 = vsyncadd (%p3059_p12), [#allocation16], 4294966784  ;;  %v2447_v0 = vmov 0.0|0.0   ;;  %vm2448_vm0 = vmmov 0   ;;  %v2449_v1 = vmov 0.0   ;;  %v502_v2 = vld [vmem:[#allocation11] sm:$0xff] }
  0xdc   : > { %1996 = vmatprep.subr.bf16.mxu0 %v2447_v0  ;;  %2002 = vmatprep.subr.bf16.mxu1 %v2447_v0  ;;  %v503_v3 = vld [vmem:[#allocation11 + $0x8] sm:$0xff]  ;;  %v603_v4 = vld [vmem:[#allocation12] sm:$0xff]  ;;  %v504_v7 = vld [vmem:[#allocation11 + $0x10] sm:$0xff]  ;;  %vm513_vm1 = vcmask 261120   ;;  %vm597_vm2 = vcmask 64512   ;;  %s2450_s24 = smov 120  }
  0xdd   : > { %1920 = vmatprep.mubr.msk.f32.mxu0 %vm2448_vm0, %v2449_v1  ;;  %1931 = vmatprep.mubr.msk.f32.mxu1 %vm2448_vm0, %v2449_v1  ;;  %v1997_v5 = vpack.c.bf16 %v503_v3, %v502_v2  ;;  %v604_v6 = vld [vmem:[#allocation12 + $0x8] sm:$0xff]  ;;  %v505_v8 = vld [vmem:[#allocation11 + $0x18] sm:$0xff]  ;;  %v605_v10 = vld [vmem:[#allocation12 + $0x10] sm:$0xff]  ;;  %598 = vst.msk [vmem:[#allocation3] sm:$0xff] %vm597_vm2, %v2449_v1  ;;  %s2451_s26 = smov 112   ;;  %s2452_s29 = smov 104  }
  0xde   : > { %v2003_v9 = vpack.c.bf16 %v604_v6, %v603_v4  ;;  %v606_v11 = vld [vmem:[#allocation12 + $0x18] sm:$0xff]  ;;  %v2000_v12 = vpack.c.bf16 %v505_v8, %v504_v7  ;;  %v501_v14 = vld [vmem:[%s430_s7] sm:$0xff]  ;;  %599 = vst.msk [vmem:[#allocation3 + $0x8] sm:$0xff] %vm597_vm2, %v2449_v1  ;;  %600 = vst.msk [vmem:[#allocation3 + $0x10] sm:$0xff] %vm597_vm2, %v2449_v1  ;;  %s3060_s28 = sld [smem:[#allocation29_spill]]  ;;  %vm588_vm3 = vcmask 7168  }
  0xdf   : > { %1998 = vmatpush3.bf16.msra.mxu0 %v1997_v5  ;;  %v2006_v13 = vpack.c.bf16 %v606_v11, %v605_v10  ;;  %v602_v15 = vld [vmem:[%s439_s27] sm:$0xff]  ;;  %601 = vst.msk [vmem:[#allocation3 + $0x18] sm:$0xff] %vm597_vm2, %v2449_v1  ;;  %v688_v16 = vld [vmem:[#allocation14] sm:$0xff]  ;;  %v689_v17 = vld [vmem:[#allocation14 + $0x8] sm:$0xff]  ;;  %v2453_v44 = vmov -inf   ;;  %v2454_v45 = vmov 0  }
  0xe0   : > { %1999 = vmatprep.subr.bf16.mxu0 %v2447_v0  ;;  %2004 = vmatpush3.bf16.msra.mxu1 %v2003_v9  ;;  %v2009_v18 = vpack.c.bf16 %v689_v17, %v688_v16  ;;  %v690_v19 = vld [vmem:[#allocation14 + $0x10] sm:$0xff]  ;;  %v691_v20 = vld [vmem:[#allocation14 + $0x18] sm:$0xff]  ;;  %589 = vst.msk [vmem:[#allocation4] sm:$0xff] %vm588_vm3, %v2453_v44  ;;  %590 = vst.msk [vmem:[#allocation4 + $0x8] sm:$0xff] %vm588_vm3, %v2453_v44  ;;  %s2455_s25 = smov 16   ;;  %s2456_s23 = smov 8  }
  0xe1   : > { %2005 = vmatprep.subr.bf16.mxu1 %v2447_v0  ;;  %v2012_v21 = vpack.c.bf16 %v691_v20, %v690_v19  ;;  %v1852_v22 = vld [vmem:[%s3018_s5] ss:$0 sm:$0xff]  ;;  %591 = vst.msk [vmem:[#allocation4 + $0x10] sm:$0xff] %vm588_vm3, %v2453_v44  ;;  %592 = vst.msk [vmem:[#allocation4 + $0x18] sm:$0xff] %vm588_vm3, %v2453_v44  ;;  %2141 = vset.pattern.permute.xlu0 %v2454_v45  ;;  %s3061_s16 = sld [smem:[#allocation24_spill]]  ;;  %s2457_s7 = smov 24  }
  0xe2   : > { %v1854_v23 = vld [vmem:[%s3019_s6] ss:$0 sm:$0xff]  ;;  %593 = vst.msk [vmem:[#allocation5] sm:$0xff] %vm588_vm3, %v2449_v1  ;;  %594 = vst.msk [vmem:[#allocation5 + $0x8] sm:$0xff] %vm588_vm3, %v2449_v1  ;;  %2142 = vset.pattern.permute.xlu1 %v2454_v45  ;;  %vm1583_vm4 = vcmask 130048   ;;  %vm1585_vm5 = vcmask 195584  }
  0xe3   : > { %2001 = vmatpush3.bf16.msra.mxu0 %v2000_v12  ;;  %595 = vst.msk [vmem:[#allocation5 + $0x10] sm:$0xff] %vm588_vm3, %v2449_v1  ;;  %596 = vst.msk [vmem:[#allocation5 + $0x18] sm:$0xff] %vm588_vm3, %v2449_v1  ;;  %s3062_s27 = sld [smem:[#allocation31_spill]]  ;;  %s496_s30 = scalar_lea.vmem [#allocation17], %s2780_s4 }
  0xe4   : > { %2007 = vmatpush3.bf16.msra.mxu1 %v2006_v13  ;;  %2008 = vmatprep.subr.bf16.mxu0 %v2447_v0  ;;  %v1856_v37 = vld [vmem:[%s3060_s28] ss:$0 sm:$0xff]  ;;  %s1687_s21 = sshll.u32 %s496_s30, 4  ;;  %s1673_s8 = scalar_lea.sflag [#allocation8], %s2777_s3  ;;  %s2965_s21 = int_to_ptr.vmem [resolvable:$true] %s1687_s21 }
  0xe5   : > { %1945 = vmatprep.subr.mxu1 %v2449_v1  ;;  %s2339_s2 = scalar_lea.vmem %s2965_s21, 128  ;;  %p3064_p13 = scmp.ne.s32.totalorder %s3049_s10, 0 }
  0xe6   : > { %1921 = vmatmul.mubr.msk.f32.vlgmr.msra.gmra.mrb[0].mxu0 %vm513_vm1, %v501_v14  ;;  %p2340_p6 = scmp.ne.s32.totalorder %s2965_s21, %s2339_s2  ;;  %s2458_s4 = smov [#allocation17]  }
  0xe7   : > { %1932 = vmatmul.mubr.msk.f32.vlgmr.msra.gmra.mrb[0].mxu1 %vm513_vm1, %v602_v15  ;;  %1942 = vmatprep.mubr.msk.f32.mxu0 %vm2448_vm0, %v2449_v1  ;;  %v2889_v50 = vld [vmem:[#allocation4] sm:$0xff]  ;;  %s1873_s19 = sshll.u32 %s3061_s16, 7  ;;  %s2343_s28 = sshll.u32 %s2458_s4, 4  ;;  %s2344_s28 = int_to_ptr.vmem [resolvable:$false] %s2343_s28 }
  0xe8   : > { %1947 = vmatprep.mubr.msk.f32.mxu1 %vm2448_vm0, %v2449_v1  ;;  %2010 = vmatpush3.bf16.msra.mxu0 %v2009_v18  ;;  %v1228_v59 = vld [vmem:[#allocation4 + $0x10] sm:$0xff]  ;;  %v1035_v18 = vld [vmem:[#allocation4 + $0x8] sm:$0xff]  ;;  %p2341_p4 = pnand %p2340_p6, %p3064_p13  ;;  %p2346_p0 = scmp.lt.s32.totalorder %s2965_s21, %s2344_s28 }
  0xe9   : > { %2011 = vmatprep.subr.bf16.mxu0 %v2447_v0 }
  0xea   : > { %v1230_v14 = vld [vmem:[#allocation5 + $0x10] sm:$0xff]  ;;  %p2342_p9 = pneg %p2341_p4 }
  0xec   : > { %2013 = vmatpush3.bf16.msra.mxu0 %v2012_v21  ;;  %v1420_v21 = vld [vmem:[#allocation4 + $0x18] sm:$0xff] }
  0xed   : > { %1965 = vmatprep.subr.mxu0 %v2449_v1 }
  0xef   : > { %1943 = vmatmul.mubr.msk.f32.vlgmr.msra.gmra.mrb[2].mxu0 %vm513_vm1, %v602_v15 }
  0xf0   : > { %1967 = vmatprep.mubr.msk.f32.mxu0 %vm2448_vm0, %v2449_v1 }
 0x1b9   : > { %v583_v24 = vpop.f32.mrb[0].mxu0 }
 0x1ba   : > { %v584_v25 = vadd.f32 %v1852_v22, %v583_v24  ;;  %v1922_v26 = vpop.f32.mrb[1].mxu0  ;;  %v684_v27 = vpop.f32.mrb[0].mxu1 }
 0x1bb   : > { %v685_v28 = vadd.f32 %v1854_v23, %v684_v27  ;;  %v1933_v29 = vpop.f32.mrb[1].mxu1 }
 0x1bc   : > { %587 = vst.msk [vmem:[#allocation2] sm:$0xff] %vm513_vm1, %v584_v25 }
 0x1bd   : > { %958 = vrot.lane.b32.xlu1 %v685_v28, %s2450_s24  ;;  %1946 = vmatpush3.xpose.msk.msra.mxu1 %vm597_vm2, %v685_v28 }
 0x1be   : > { %1950 = vmatprep.subr.mxu1 %v2449_v1 }
 0x1c2   : > { %v765_v38 = vpop.f32.mrb[2].mxu0 }
 0x1c3   : > { %v954_v30 = vld [vmem:[#allocation2] sm:$0xff]  ;;  %v2870_v39 = vadd.f32 %v1856_v37, %v765_v38  ;;  %v1944_v40 = vpop.f32.mrb[3].mxu0 }
 0x1c4   : > { %956 = vrot.lane.b32.xlu1 %v954_v30, %s2450_s24  ;;  %1948 = vmatmul.mubr.msk.f32.vlgmr.msra.gmra.mrb[2].mxu1 %vm597_vm2, %v954_v30 }
 0x1c5   : > { %1952 = vmatprep.mubr.msk.f32.mxu1 %vm2448_vm0, %v2449_v1  ;;  %1951 = vmatpush3.msra.mxu1 %v2870_v39 }
 0x1c6   : > { %1955 = vmatprep.subr.mxu1 %v2449_v1 }
 0x1c8   : > { %1151 = vrot.lane.b32.xlu1 %v685_v28, %s2451_s26 }
 0x1cc   : > { %1149 = vrot.lane.b32.xlu1 %v954_v30, %s2451_s26 }
 0x1d0   : > { %1343 = vrot.lane.b32.xlu1 %v685_v28, %s2452_s29 }
 0x1d4   : > { %1341 = vrot.lane.b32.xlu1 %v954_v30, %s2452_s29 }
 0x22f   : > { %v959_v31 = vpop.permute.xlu1 %958 }
 0x236   : > { %v957_v32 = vpop.permute.xlu1 %956 }
 0x23a   : > { %v1152_v33 = vpop.permute.xlu1 %1151 }
 0x23b   : > { %1966 = vmatpush3.xpose.msk.msra.mxu0 %vm597_vm2, %v1152_v33 }
 0x23c   : > { %1975 = vmatprep.subr.mxu0 %v2449_v1 }
 0x23e   : > { %v1150_v34 = vpop.permute.xlu1 %1149 }
 0x23f   : > { %1968 = vmatmul.mubr.msk.f32.vlgmr.msra.gmra.mrb[4].mxu0 %vm597_vm2, %v1150_v34 }
 0x240   : > { %1977 = vmatprep.mubr.msk.f32.mxu0 %vm2448_vm0, %v2449_v1 }
 0x242   : > { %v1344_v35 = vpop.permute.xlu1 %1343 }
 0x243   : > { %1976 = vmatpush3.xpose.msk.msra.mxu0 %vm597_vm2, %v1344_v35 }
 0x244   : > { %2014 = vmatprep.subr.bf16.mxu0 %v2447_v0 }
 0x246   : > { %v1342_v36 = vpop.permute.xlu1 %1341 }
 0x247   : > { %1978 = vmatmul.mubr.msk.f32.vlgmr.msra.gmra.mrb[6].mxu0 %vm597_vm2, %v1342_v36 }
 0x248   : > { %1993 = vmatprep.mubr.msk.f32.mxu0 %vm2448_vm0, %v2449_v1 }
 0x297   : > { %v843_v41 = vpop.f32.mrb[2].mxu1 }
 0x298   : > { %v1949_v42 = vpop.f32.mrb[3].mxu1  ;;  %v849_v43 = vsel %vm597_vm2, %v843_v41, -inf }
 0x299   : > { %850 = vmax.xlane.f32.xlu0 %v849_v43 }
 0x312   : > { %v1223_v46 = vpop.f32.mrb[4].mxu0 }
 0x313   : > { %v1969_v47 = vpop.f32.mrb[5].mxu0  ;;  %v1231_v54 = vsel %vm597_vm2, %v1223_v46, -inf }
 0x314   : > { %v1037_v47 = vld [vmem:[#allocation5 + $0x8] sm:$0xff] }
 0x31a   : > { %v2887_v48 = vpop.f32.mrb[6].mxu0 }
 0x31b   : > { %v1979_v49 = vpop.f32.mrb[7].mxu0  ;;  %v1423_v11 = vsel %vm597_vm2, %v2887_v48, -inf }
 0x326   : > { %v851_v51 = vpop.xlane.xlu0 %850 }
 0x327   : > { %v2892_v52 = vmax.f32 %v2889_v50, %v851_v51  ;;  %v848_v51 = vld [vmem:[#allocation5] sm:$0xff] }
 0x329   : > { %v853_v53 = vsub.f32 %v2889_v50, %v2892_v52  ;;  %871 = vst.msk [vmem:[#allocation4] sm:$0xff] %vm588_vm3, %v2892_v52  ;;  %858 = vperm.xlu0 %2141, %v2892_v52  }
 0x32b   : > { %v854_v43 = vmul.f32 1.442695, %v853_v53 }
 0x348   : > { %1232 = vmax.xlane.f32.xlu0 %v1231_v54 }
 0x3a8   : > { %v859_v55 = vpop.permute.xlu0 %858 }
 0x3a9   : > { %v861_v56 = vsub.f32 %v843_v41, %v859_v55  ;;  %v1422_v55 = vld [vmem:[#allocation5 + $0x18] sm:$0xff] }
 0x3ab   : > { %v862_v57 = vmul.f32 1.442695, %v861_v56 }
 0x3ad   : > { %2143 = vpow2.f32 %v862_v57 }
 0x3b7   : > { %v2900_v58 = vpop.eup %2143 }
 0x3b8   : > { %1953 = vmatmul.mubr.msk.f32.vlgmr.msra.gmra.mrb[4].mxu1 %vm597_vm2, %v2900_v58  ;;  %v865_v38 = vsel %vm597_vm2, %v2900_v58, 0.0 }
 0x3b9   : > { %1956 = vmatpush3.xpose.msk.msra.mxu1 %vm597_vm2, %v959_v31  ;;  %1957 = vmatprep.mubr.msk.f32.mxu1 %vm2448_vm0, %v2449_v1 }
 0x3ba   : > { %1960 = vmatprep.subr.mxu1 %v2449_v1 }
 0x3bc   : > { %1958 = vmatmul.mubr.msk.f32.vlgmr.msra.gmra.mrb[6].mxu1 %vm597_vm2, %v957_v32 }
 0x3bd   : > { %1962 = vmatprep.mubr.msk.f32.mxu1 %vm2448_vm0, %v2449_v1 }
 0x3d5   : > { %v1233_v60 = vpop.xlane.xlu0 %1232 }
 0x3d6   : > { %v1234_v61 = vmax.f32 %v1228_v59, %v1233_v60 }
 0x3d8   : > { %v1235_v62 = vsub.f32 %v1228_v59, %v1234_v61  ;;  %1252 = vst.msk [vmem:[#allocation4 + $0x10] sm:$0xff] %vm588_vm3, %v1234_v61  ;;  %1240 = vperm.xlu0 %2141, %v1234_v61  }
 0x3da   : > { %v1236_v12 = vmul.f32 1.442695, %v1235_v62 }
 0x457   : > { %v1241_v63 = vpop.permute.xlu0 %1240 }
 0x458   : > { %v1243_v2 = vsub.f32 %v1223_v46, %v1241_v63 }
 0x45a   : > { %v1244_v3 = vmul.f32 1.442695, %v1243_v2 }
 0x45c   : > { %2145 = vpow2.f32 %v1244_v3  ;;  %v945_v3 = vld [vmem:[#allocation3] sm:$0xff] }
 0x45d   : > { %2147 = vpow2.f32 %v1236_v12 }
 0x466   : > { %v2146_v4 = vpop.eup %2145 }
 0x467   : > { %v1247_v5 = vsel %vm597_vm2, %v2146_v4, 0.0  ;;  %v2148_v13 = vpop.eup %2147 }
 0x468   : > { %1248 = vadd.xlane.f32.xlu0 %v1247_v5  ;;  %v1246_v15 = vmul.f32 %v2148_v13, %v1230_v14  ;;  %v1330_v14 = vld [vmem:[#allocation3 + $0x10] sm:$0xff] }
 0x48b   : > { %v2913_v6 = vpop.f32.mrb[4].mxu1 }
 0x48c   : > { %v1954_v7 = vpop.f32.mrb[5].mxu1 }
 0x48f   : > { %v1030_v8 = vpop.f32.mrb[6].mxu1 }
 0x490   : > { %v1959_v9 = vpop.f32.mrb[7].mxu1  ;;  %v1038_v10 = vsel %vm597_vm2, %v1030_v8, -inf }
 0x491   : > { %1039 = vmax.xlane.f32.xlu1 %v1038_v10 }
 0x495   : > { %1424 = vmax.xlane.f32.xlu1 %v1423_v11  ;;  %v1138_v11 = vld [vmem:[#allocation3 + $0x8] sm:$0xff] }
 0x4f5   : > { %v1249_v16 = vpop.xlane.xlu0 %1248 }
 0x4f6   : > { %v1250_v17 = vadd.f32 %v1249_v16, %v1246_v15 }
 0x4f8   : > { %1251 = vst.msk [vmem:[#allocation5 + $0x10] sm:$0xff] %vm588_vm3, %v1250_v17 }
 0x4ff   : > { %v1552_v42 = vld [vmem:[#allocation5 + $0x10] sm:$0xff] }
 0x51e   : > { %v1040_v19 = vpop.xlane.xlu1 %1039 }
 0x51f   : > { %v1041_v20 = vmax.f32 %v1035_v18, %v1040_v19  ;;  %v1587_v19 = vld [vmem:[#allocation15] sm:$0xff] }
 0x521   : > { %v1042_v22 = vsub.f32 %v1035_v18, %v1041_v20  ;;  %1059 = vst.msk [vmem:[#allocation4 + $0x8] sm:$0xff] %vm588_vm3, %v1041_v20  ;;  %1047 = vperm.xlu1 %2142, %v1041_v20   ;;  %v1588_v20 = vld [vmem:[#allocation15 + $0x8] sm:$0xff] }
 0x522   : > { %v1425_v23 = vpop.xlane.xlu1 %1424 }
 0x523   : > { %v1426_v24 = vmax.f32 %v1420_v21, %v1425_v23  ;;  %v1043_v41 = vmul.f32 1.442695, %v1042_v22  ;;  %v2015_v22 = vpack.c.bf16 %v1588_v20, %v1587_v19 }
 0x525   : > { %v1427_v25 = vsub.f32 %v1420_v21, %v1426_v24  ;;  %1444 = vst.msk [vmem:[#allocation4 + $0x18] sm:$0xff] %vm588_vm3, %v1426_v24  ;;  %1432 = vperm.xlu1 %2142, %v1426_v24   ;;  %v1522_v21 = vld [vmem:[#allocation3 + $0x18] sm:$0xff]  ;;  %2016 = vmatpush3.bf16.msra.mxu0 %v2015_v22 }
 0x526   : > { %2017 = vmatprep.subr.bf16.mxu0 %v2447_v0 }
 0x527   : > { %v1428_v40 = vmul.f32 1.442695, %v1427_v25 }
 0x529   : > { %1061 = vrot.lane.b32.xlu1 %v2870_v39, %s2450_s24 }
 0x52d   : > { %1253 = vrot.lane.b32.xlu1 %v2870_v39, %s2451_s26  ;;  %s3063_s26 = sld [smem:[#allocation32_spill]] }
 0x531   : > { %1445 = vrot.lane.b32.xlu1 %v2870_v39, %s2452_s29 }
 0x533   : > { %s2963_s29 = scalar_lea.hbm %s3063_s26, %s1873_s19 }
 0x5a0   : > { %v1048_v26 = vpop.permute.xlu1 %1047 }
 0x5a1   : > { %v1050_v27 = vsub.f32 %v1030_v8, %v1048_v26 }
 0x5a3   : > { %v1051_v28 = vmul.f32 1.442695, %v1050_v27 }
 0x5a4   : > { %v1433_v29 = vpop.permute.xlu1 %1432 }
 0x5a5   : > { %2149 = vpow2.f32 %v1051_v28  ;;  %v1435_v30 = vsub.f32 %v2887_v48, %v1433_v29 }
 0x5a7   : > { %v1436_v31 = vmul.f32 1.442695, %v1435_v30 }
 0x5a8   : > { %v1062_v32 = vpop.permute.xlu1 %1061 }
 0x5a9   : > { %2151 = vpow2.f32 %v1436_v31  ;;  %1961 = vmatpush3.msra.mxu1 %v1062_v32  ;;  %v1589_v31 = vld [vmem:[#allocation15 + $0x10] sm:$0xff]  ;;  %v1590_v32 = vld [vmem:[#allocation15 + $0x18] sm:$0xff] }
 0x5aa   : > { %1970 = vmatprep.subr.mxu1 %v2449_v1  ;;  %2153 = vpow2.f32 %v1428_v40 }
 0x5ab   : > { %2155 = vpow2.f32 %v1043_v41 }
 0x5ac   : > { %v1254_v33 = vpop.permute.xlu1 %1253  ;;  %2157 = vrcp.f32 %v1552_v42 }
 0x5ad   : > { %2159 = vpow2.f32 %v854_v43 }
 0x5af   : > { %v2150_v34 = vpop.eup %2149 }
 0x5b0   : > { %1963 = vmatmul.mubr.msk.f32.vlgmr.msra.gmra.mrb[8].mxu1 %vm597_vm2, %v2150_v34  ;;  %v1054_v35 = vsel %vm597_vm2, %v2150_v34, 0.0  ;;  %v1446_v37 = vpop.permute.xlu1 %1445 }
 0x5b1   : > { %1971 = vmatpush3.msra.mxu1 %v1254_v33  ;;  %1055 = vadd.xlane.f32.xlu1 %v1054_v35  ;;  %v2018_v33 = vpack.c.bf16 %v1590_v32, %v1589_v31 }
 0x5b2   : > { %1972 = vmatprep.mubr.msk.f32.mxu1 %vm2448_vm0, %v2449_v1  ;;  %1980 = vmatprep.subr.mxu1 %v2449_v1 }
 0x5b3   : > { %v2152_v36 = vpop.eup %2151  ;;  %2019 = vmatpush3.bf16.msra.mxu0 %v2018_v33 }
 0x5b4   : > { %1973 = vmatmul.mubr.msk.f32.vlgmr.msra.gmra.mrb[10].mxu1 %vm597_vm2, %v2146_v4  ;;  %v1439_v39 = vsel %vm597_vm2, %v2152_v36, 0.0  ;;  %v2154_v44 = vpop.eup %2153 }
 0x5b5   : > { %1981 = vmatpush3.msra.mxu1 %v1446_v37  ;;  %866 = vadd.xlane.f32.xlu1 %v865_v38  ;;  %v2156_v45 = vpop.eup %2155  ;;  %v1438_v52 = vmul.f32 %v2154_v44, %v1422_v55 }
 0x5b6   : > { %1440 = vadd.xlane.f32.xlu0 %v1439_v39  ;;  %1982 = vmatprep.mubr.msk.f32.mxu1 %vm2448_vm0, %v2449_v1  ;;  %v2158_v46 = vpop.eup %2157  ;;  %v1053_v48 = vmul.f32 %v2156_v45, %v1037_v47  ;;  %v1870_v47 = vld [vmem:[%s3062_s27] ss:$0 sm:$0xff] }
 0x5b7   : > { %v2160_v1 = vpop.eup %2159 }
 0x5b8   : > { %1983 = vmatmul.mubr.msk.f32.vlgmr.msra.gmra.mrb[12].mxu1 %vm597_vm2, %v2152_v36  ;;  %v864_v50 = vmul.f32 %v2160_v1, %v848_v51 }
 0x5c6   : > { %1333 = vperm.xlu1 %2142, %v2148_v13  }
 0x5ca   : > { %1525 = vperm.xlu1 %2142, %v2154_v44  }
 0x5cc   : > { %1141 = vperm.xlu0 %2141, %v2156_v45  }
 0x5ce   : > { %1557 = vperm.xlu1 %2142, %v2158_v46  }
 0x5d2   : > { %948 = vperm.xlu1 %2142, %v2160_v1  }
 0x63e   : > { %v1056_v49 = vpop.xlane.xlu1 %1055 }
 0x63f   : > { %v1057_v54 = vadd.f32 %v1056_v49, %v1053_v48 }
 0x641   : > { %1058 = vst.msk [vmem:[#allocation5 + $0x8] sm:$0xff] %vm588_vm3, %v1057_v54 }
 0x642   : > { %v867_v53 = vpop.xlane.xlu1 %866 }
 0x643   : > { %v1441_v56 = vpop.xlane.xlu0 %1440  ;;  %v868_v57 = vadd.f32 %v867_v53, %v864_v50 }
 0x644   : > { %v1442_v58 = vadd.f32 %v1441_v56, %v1438_v52 }
 0x645   : > { %870 = vst.msk [vmem:[#allocation5] sm:$0xff] %vm588_vm3, %v868_v57 }
 0x646   : > { %1443 = vst.msk [vmem:[#allocation5 + $0x18] sm:$0xff] %vm588_vm3, %v1442_v58  ;;  %v1334_v59 = vpop.permute.xlu1 %1333 }
 0x647   : > { %v1336_v18 = vmul.f32 %v1334_v59, %v1330_v14 }
 0x648   : > { %v1543_v60 = vld [vmem:[#allocation5 + $0x8] sm:$0xff] }
 0x649   : > { %2161 = vrcp.f32 %v1543_v60 }
 0x64a   : > { %v1526_v61 = vpop.permute.xlu1 %1525 }
 0x64b   : > { %v1142_v12 = vpop.permute.xlu0 %1141  ;;  %v1528_v25 = vmul.f32 %v1526_v61, %v1522_v21 }
 0x64c   : > { %v1534_v2 = vld [vmem:[#allocation5] sm:$0xff]  ;;  %v1144_v13 = vmul.f32 %v1142_v12, %v1138_v11 }
 0x64d   : > { %v1561_v62 = vld [vmem:[#allocation5 + $0x18] sm:$0xff] }
 0x64e   : > { %v1558_v63 = vpop.permute.xlu1 %1557  ;;  %2163 = vrcp.f32 %v1561_v62 }
 0x64f   : > { %2165 = vrcp.f32 %v1534_v2 }
 0x652   : > { %v949_v4 = vpop.permute.xlu1 %948 }
 0x653   : > { %v2162_v5 = vpop.eup %2161  ;;  %v951_v7 = vmul.f32 %v949_v4, %v945_v3 }
 0x654   : > { %1548 = vperm.xlu0 %2141, %v2162_v5  }
 0x655   : > { %v952_v8 = vadd.f32 %v951_v7, %v2913_v6 }
 0x657   : > { %953 = vst.msk [vmem:[#allocation3] sm:$0xff] %vm597_vm2, %v952_v8 }
 0x658   : > { %v2164_v9 = vpop.eup %2163 }
 0x659   : > { %1566 = vperm.xlu0 %2141, %v2164_v9   ;;  %v2166_v10 = vpop.eup %2165 }
 0x65d   : > { %1539 = vperm.xlu0 %2141, %v2166_v10  }
 0x65e   : > { %v1536_v40 = vld [vmem:[#allocation3] sm:$0xff] }
 0x683   : > { %v1133_v15 = vpop.f32.mrb[8].mxu1 }
 0x684   : > { %v1145_v16 = vadd.f32 %v1144_v13, %v1133_v15  ;;  %v1964_v17 = vpop.f32.mrb[9].mxu1 }
 0x686   : > { %1146 = vst.msk [vmem:[#allocation3 + $0x8] sm:$0xff] %vm597_vm2, %v1145_v16 }
 0x687   : > { %v1325_v6 = vpop.f32.mrb[10].mxu1 }
 0x688   : > { %v1337_v23 = vadd.f32 %v1336_v18, %v1325_v6  ;;  %v1974_v24 = vpop.f32.mrb[11].mxu1 }
 0x68a   : > { %1338 = vst.msk [vmem:[#allocation3 + $0x10] sm:$0xff] %vm597_vm2, %v1337_v23 }
 0x68b   : > { %v1517_v26 = vpop.f32.mrb[12].mxu1 }
 0x68c   : > { %v1529_v27 = vadd.f32 %v1528_v25, %v1517_v26  ;;  %v1984_v28 = vpop.f32.mrb[13].mxu1 }
 0x68d   : > { %v1545_v34 = vld [vmem:[#allocation3 + $0x8] sm:$0xff] }
 0x68e   : > { %1530 = vst.msk [vmem:[#allocation3 + $0x18] sm:$0xff] %vm597_vm2, %v1529_v27 }
 0x691   : > { %v1554_v29 = vld [vmem:[#allocation3 + $0x10] sm:$0xff] }
 0x692   : > { %v1560_v30 = vmul.f32 %v1558_v63, %v1554_v29 }
 0x694   : > { %1575 = vrot.lane.b32.xlu0 %v1560_v30, %s2455_s25  ;;  %s2345_s25 = scalar_lea.vmem %s2344_s28, 256 }
 0x695   : > { %v1563_v0 = vld [vmem:[#allocation3 + $0x18] sm:$0xff]  ;;  %p2347_p7 = scmp.lt.s32.totalorder %s2345_s25, %s2339_s2 }
 0x697   : > { %p2348_p11 = por %p2347_p7, %p2346_p0 }
 0x699   : > { %p2349_p2 = pnand %p2348_p11, %p2342_p9 }
 0x6d3   : > { %v1549_v35 = vpop.permute.xlu0 %1548 }
 0x6d4   : > { %v1551_v36 = vmul.f32 %v1549_v35, %v1545_v34 }
 0x6d6   : > { %1571 = vrot.lane.b32.xlu1 %v1551_v36, %s2456_s23 }
 0x6d8   : > { %v1567_v37 = vpop.permute.xlu0 %1566 }
 0x6d9   : > { %v1569_v38 = vmul.f32 %v1567_v37, %v1563_v0 }
 0x6db   : > { %1579 = vrot.lane.b32.xlu1 %v1569_v38, %s2457_s7 }
 0x6dc   : > { %v1540_v39 = vpop.permute.xlu0 %1539 }
 0x6dd   : > { %v1542_v41 = vmul.f32 %v1540_v39, %v1536_v40 }
 0x706   : > { %v1576_v44 = vpop.permute.xlu0 %1575 }
 0x748   : > { %v1572_v42 = vpop.permute.xlu1 %1571 }
 0x749   : > { %v1582_v43 = vsel %vm597_vm2, %v1542_v41, %v1572_v42 }
 0x74a   : > { %v1584_v45 = vsel %vm1583_vm4, %v1582_v43, %v1576_v44 }
 0x74d   : > { %v1580_v46 = vpop.permute.xlu1 %1579 }
 0x74e   : > { %v1586_v1 = vsel %vm1585_vm5, %v1584_v45, %v1580_v46 }
 0x74f   : > { %1994 = vmatmul.mubr.msk.f32.vlgmr.msra.gmra.mrb[8].mxu0 %vm513_vm1, %v1586_v1 }
 0x822   : > { %v1667_v48 = vpop.f32.mrb[8].mxu0 }
 0x823   : > { %v1668_v49 = vadd.f32 %v1870_v47, %v1667_v48  ;;  %v1995_v51 = vpop.f32.mrb[9].mxu0 }
 0x825   : > { %1671 = vst.msk [vmem:[%s496_s30] sm:$0xff] %vm513_vm1, %v1668_v49 }
 0x826   : > { %2352 = shalt.err (!%p2349_p2)
}
 0x827   : > { %s2353_s3 = scalar_lea.hbm %s2963_s29, 128  ;;  %s2357_s7 = scalar_lea.hbm %s3063_s26, 256 }
 0x828   : > { %p2354_p10 = scmp.ne.s32.totalorder %s2963_s29, %s2353_s3  ;;  %p2358_p8 = scmp.lt.u32.totalorder %s2963_s29, %s3063_s26 }
 0x829   : > { %p2359_p3 = scmp.lt.u32.totalorder %s2357_s7, %s2353_s3  ;;  %p2361_p6 = scmp.lt.u32.totalorder %s2353_s3, %s2963_s29 }
 0x82a   : > { %p2355_p1 = pnand %p2354_p10, %p3064_p13 }
 0x82b   : > { %p2360_p12 = por %p2359_p3, %p2358_p8 }
 0x82c   : > { %p2356_p5 = pneg %p2355_p1 }
 0x82d   : > { %p2362_p4 = por %p2361_p6, %p2360_p12 }
 0x82f   : > { %p2363_p9 = pnand %p2362_p4, %p2356_p5 }
 0x831   : > { %2366 = shalt.err (!%p2363_p9)
}
 0x832   : > { %2040 = dma.vmem_to_hbm [thread:$0]  (%p3064_p13), %s2965_s21, 128, %s2963_s29, %s1673_s8  }
 0x833 PF: > { %s1699_s27 = sand.u32 1, %s2417_s13   ;;  %p3065_p0 = scmp.ne.s32.totalorder %s3050_s12, 0 }
 0x834   : > { %p3066_p7 = scmp.ge.s32.totalorder %s2437_s18, 2  ;;  %s1700_s19 = scalar_lea.sflag [#allocation8], %s1699_s27 }
 0x836   : > { %p2063_p11 = pnand %p3066_p7, %p3065_p0 }
 0x838   : > { %2412 = dma.done.wait (!%p2063_p11), %s1700_s19, 128  }
 0x839   : > { %2414 = vsyncadd (!%p2063_p11), %s1700_s19, 4294967168  ;;  %s31_s18 = sadd.s32 1, %s2437_s18   ;;  %s3067_s10 = sld [smem:[#allocation25_spill]] }
 0x83a   : > { %p28_p2 = scmp.ge.s32.totalorder %s31_s18, 4   ;;  %s3068_s13 = smov %s2421_s14 }
 0x83b   : > { %s3069_s14 = smov %s2425_s15  ;;  %s3070_s15 = smov %s2698_s11 }
 0x83c   : > { %s3071_s16 = smov %s2433_s17  ;;  %30 = sbr.rel (!%p28_p2) target bundleno = 18 (0x12), region = 151 }
 0x83f   : > { %s3072_s17 = smov %s3067_s10 }
 0x843   :  { %1705 = vsyncpa [#allocation7], 1 }
 0x844   :  { %1707 = vsyncpa [#allocation7 + $0x1], 1 }
 0x845   :  { %1708 = vsyncpa [#allocation10], 1 }
 0x846   :  { %1710 = vsyncpa [#allocation10 + $0x1], 1 }
 0x847   :  { %1711 = vsyncpa [#allocation13], 1 }
 0x848   :  { %1712 = vsyncpa [#allocation16], 1 }
 0x849   :  { %1713 = vsyncpa [#allocation8], 1 }
 0x84a   :  { %1715 = vsyncpa [#allocation8 + $0x1], 1 }

</bundles_post_ra>
